<compile_context>
chip_gen: v6e
topology: v6e:2x2x1
jax: 0.10.0
libtpu: 0.0.40
codegen_flags: <defaults>
</compile_context>

<pallas_src>
import jax
import jax.numpy as jnp
from jax.experimental import pallas as pl
from jax.experimental.pallas import tpu as pltpu


# ------------------------------ small helpers -------------------------------

def _round_up(v, m):
    return ((v + m - 1) // m) * m


def _physical_vmem_bytes():
    """Physical VMEM of the current generation (conservative 64 MiB fallback)."""
    try:
        return int(pltpu.get_tpu_info().vmem_capacity_bytes)
    except Exception:
        return 64 * 1024 * 1024


def _vmem_limit_bytes(footprint, phys):
    """Scoped-VMEM limit >= estimated footprint (+headroom), <= 90% physical."""
    return int(min(0.9 * phys, max(footprint * 1.4 + (4 << 20), 32 << 20)))


# -------------------------- conv path (use_conv=True) -----------------------

def downsample_conv2d(x, w, b, *, padding=1, compute_dtype=jnp.bfloat16):
    """Conv2d(kernel=3, stride=2, padding=padding) on NCHW input.

    x: [N, Cin, H, W], w: [Cout, Cin, 3, 3] (OIHW, PyTorch), b: [Cout].
    Returns [N, Cout, Ho, Wo].  MXU operands are cast to `compute_dtype`
    (bfloat16 by default; pass compute_dtype=jnp.float32 for full precision)
    and accumulated in float32.
    """
    N, Cin, H, W = x.shape
    Cout = w.shape[0]
    Ho = (H + 2 * padding - 3) // 2 + 1
    Wo = (W + 2 * padding - 3) // 2 + 1
    Hq = Ho + 1                       # row-parity views keep one halo row
    M = Ho * Wo
    out_dtype = x.dtype
    cdt = compute_dtype or x.dtype
    in_bytes = jnp.dtype(cdt).itemsize
    out_bytes = jnp.dtype(out_dtype).itemsize

    # --- channel padding (exact): reduction zeros contribute nothing, extra
    # output channels come from zero weights/bias and are sliced off below.
    Cp = _round_up(Cin, 128)
    Coutp = _round_up(Cout, 128)

    # --- glue: NCHW->NHWC transpose + cast, zero pad, 6 pre-shifted views.
    # Rows: kh=0 -> even rows @0, kh=1 -> odd rows @0, kh=2 -> even rows @1
    #       (the row offset is a free slice of a non-sublane axis in-kernel).
    # Cols: kw=0 -> even cols @0, kw=1 -> odd cols @0, kw=2 -> even cols @2
    #       (pre-shifted, so no in-kernel sublane-offset slice is needed).
    xn = jnp.transpose(x, (0, 2, 3, 1)).astype(cdt)                 # [N,H,W,Cin]
    xp = jnp.pad(xn, ((0, 0), (padding, padding + 2),
                      (padding, padding + 2), (0, Cp - Cin)))
    vEA = xp[:, 0::2, 0::2, :][:, :Hq, :Wo]
    vEB = xp[:, 0::2, 1::2, :][:, :Hq, :Wo]
    vEC = xp[:, 0::2, 2::2, :][:, :Hq, :Wo]
    vOA = xp[:, 1::2, 0::2, :][:, :Hq, :Wo]
    vOB = xp[:, 1::2, 1::2, :][:, :Hq, :Wo]
    vOC = xp[:, 1::2, 2::2, :][:, :Hq, :Wo]
    # TODO(synk): read the single padded NHWC tensor with manual strided DMA
    # (memory_space=pl.ANY + pl.ds(..., stride=2)) to drop these view writes.

    wt = jnp.transpose(w, (2, 3, 1, 0)).astype(cdt)                 # [3,3,Cin,Cout]
    wt = jnp.pad(wt, ((0, 0), (0, 0), (0, Cp - Cin), (0, Coutp - Cout)))
    bias = jnp.pad(b.astype(jnp.float32), (0, Coutp - Cout)).reshape(1, Coutp)

    # --- footprint-driven tile selection: prefer full batch fold (weight
    # single-pass), then big Cout tiles (x single-pass), then full Cin
    # (single reduction step).  Cin tiling costs no extra HBM traffic.
    phys = _physical_vmem_bytes()
    budget = int(0.7 * phys)

    def chan_tiles(Cfull):
        cands = []
        for c in (Cfull, 512, 384, 256, 128):
            if c <= Cfull and Cfull % c == 0 and c % 128 == 0 and c not in cands:
                cands.append(c)
        return cands

    def batch_tiles():
        cands = []
        for nbc in (N, 16, 8, 4, 2, 1):
            if 0 < nbc <= N and N % nbc == 0 and nbc not in cands:
                # output block sublane dim must be a multiple of 8 (or full)
                if nbc == N or (nbc * M) % 8 == 0:
                    cands.append(nbc)
        return cands

    def footprint(nbc, tcc, tnc):
        lhs = 6 * nbc * Hq * Wo * tcc * in_bytes
        wgt = 9 * tcc * tnc * in_bytes
        out = nbc * M * tnc * out_bytes
        acc = nbc * M * tnc * 4
        return 2 * (lhs + wgt + out + 512) + acc

    nb, tc, tn, found = 1, 128, 128, False
    for nbc in batch_tiles():
        for tnc in chan_tiles(Coutp):
            for tcc in chan_tiles(Cp):
                if footprint(nbc, tcc, tnc) <= budget:
                    nb, tc, tn, found = nbc, tcc, tnc, True
                    break
            if found:
                break
        if found:
            break
    if not found:
        nb, tc, tn = batch_tiles()[-1], 128, 128

    # --- keep >=2 blocks on a parallel axis (2-TensorCore chips); cheap on
    # single-core generations (one extra x pass or one extra small-weight pass).
    if (N // nb) == 1 and (Coutp // tn) == 1:
        if Coutp >= 256 and (Coutp // 2) % 128 == 0:
            tn = Coutp // 2
        elif N >= 2:
            half = N // 2
            if (half * M) % 8 == 0:
                nb = half

    NB, NJ, NK = N // nb, Coutp // tn, Cp // tc
    nb_m = nb * M
    fp = footprint(nb, tc, tn)

    # tap -> (view index, kh, kw, row offset inside the even/odd-row view)
    taps = []
    for kh in range(3):
        row = 0 if kh != 1 else 1
        dh = 1 if kh == 2 else 0
        for kw in range(3):
            taps.append((row * 3 + kw, kh, kw, dh))

    def kernel(vEA_r, vEB_r, vEC_r, vOA_r, vOB_r, vOC_r, w_ref, b_ref,
               o_ref, acc_ref):
        k = pl.program_id(2)

        @pl.when(k == 0)
        def _init():
            acc_ref[...] = jnp.zeros_like(acc_ref)

        views = (vEA_r, vEB_r, vEC_r, vOA_r, vOB_r, vOC_r)
        for vi, kh, kw, dh in taps:
            a = views[vi][:, dh:dh + Ho, :, :].reshape(nb_m, tc)
            acc_ref[...] += jnp.dot(a, w_ref[kh, kw],
                                    preferred_element_type=jnp.float32)

        @pl.when(k == pl.num_programs(2) - 1)
        def _store():
            o_ref[...] = (acc_ref[...] + b_ref[...]).astype(o_ref.dtype)

    view_spec = pl.BlockSpec((nb, Hq, Wo, tc), lambda n, j, k: (n, 0, 0, k))

    out2 = pl.pallas_call(
        kernel,
        out_shape=jax.ShapeDtypeStruct((N * M, Coutp), out_dtype),
        grid_spec=pltpu.PrefetchScalarGridSpec(
            num_scalar_prefetch=0,
            grid=(NB, NJ, NK),
            in_specs=[
                view_spec, view_spec, view_spec,
                view_spec, view_spec, view_spec,
                pl.BlockSpec((3, 3, tc, tn), lambda n, j, k: (0, 0, k, j)),
                pl.BlockSpec((1, tn), lambda n, j, k: (0, j)),
            ],
            out_specs=pl.BlockSpec((nb_m, tn), lambda n, j, k: (n, j)),
            scratch_shapes=[pltpu.VMEM((nb_m, tn), jnp.float32)],
        ),
        compiler_params=pltpu.CompilerParams(
            dimension_semantics=("parallel", "parallel", "arbitrary"),
            vmem_limit_bytes=_vmem_limit_bytes(fp, phys),
        ),
    )(vEA, vEB, vEC, vOA, vOB, vOC, wt, bias)

    # NHWC -> NCHW to match the module contract.
    # TODO(synk): keep the activation NHWC end-to-end (or emit NCHW from the
    # kernel) when the consumer accepts channel-last; this transpose is pure
    # layout plumbing on the (4x-smaller) output.
    out = out2.reshape(N, Ho, Wo, Coutp)[..., :Cout]
    return jnp.transpose(out, (0, 3, 1, 2))


# ------------------------- pool path (use_conv=False) -----------------------

def downsample_avgpool2d(x):
    """AvgPool2d(kernel=2, stride=2) on NCHW input: [N,C,H,W] -> [N,C,H//2,W//2]."""
    N, C, H, W = x.shape
    Ho, Wo = H // 2, W // 2
    out_dtype = x.dtype
    if H != 2 * Ho:                       # floor semantics for odd H
        x = x[:, :, :2 * Ho, :]

    # Free reshape of the contiguous NCHW buffer: each row holds one 2-row band.
    R = N * C * Ho
    x2 = x.reshape(R, 2 * W)

    itemsize = jnp.dtype(x.dtype).itemsize
    # Group g row-pairs per kernel row so the OUTPUT is lane-dense.  128 lanes
    # suffice for unmasked stores and keep the block-diagonal pooling matmul
    # under the HBM roofline for f32 operands on v5e (256 only for <=2B dtypes).
    g_target = max(1, (256 if itemsize <= 2 else 128) // max(Wo, 1))
    g = 1
    while g * 2 <= g_target and R % (g * 2) == 0:
        g *= 2
    R2 = R // g
    x2 = x2.reshape(R2, g * 2 * W)

    # 2x2 mean as one MXU matmul against a tiny 0.25-valued pooling matrix
    # (block-diagonal over the g grouped row-pairs); f32 accumulation.
    w_idx = jnp.arange(2 * W) % W
    p_small = (w_idx[:, None] // 2 ==
               jnp.arange(Wo)[None, :]).astype(jnp.float32) * 0.25
    P = p_small if g == 1 else jnp.kron(jnp.eye(g, dtype=jnp.float32), p_small)
    P = P.astype(x2.dtype)

    # Row tiling: ~2 MiB input blocks (near the HBM roofline), multiple of 8.
    row_bytes = g * 2 * W * itemsize
    tr = max(8, min(512, (2 * 1024 * 1024) // max(row_bytes, 1)))
    tr = max(8, (tr // 8) * 8)
    tr = min(tr, _round_up(R2, 8))
    Rp = _round_up(R2, tr)
    if Rp != R2:
        x2 = jnp.pad(x2, ((0, Rp - R2), (0, 0)))
    grid = (Rp // tr,)

    def kernel(x_ref, p_ref, o_ref):
        o_ref[...] = jnp.dot(x_ref[...], p_ref[...],
                             preferred_element_type=jnp.float32
                             ).astype(o_ref.dtype)

    phys = _physical_vmem_bytes()
    fp = 2 * (tr * g * 2 * W * itemsize
              + g * 2 * W * g * Wo * itemsize
              + tr * g * Wo * itemsize)

    out = pl.pallas_call(
        kernel,
        out_shape=jax.ShapeDtypeStruct((Rp, g * Wo), out_dtype),
        grid_spec=pltpu.PrefetchScalarGridSpec(
            num_scalar_prefetch=0,
            grid=grid,
            in_specs=[
                pl.BlockSpec((tr, g * 2 * W), lambda i: (i, 0)),
                pl.BlockSpec((g * 2 * W, g * Wo), lambda i: (0, 0)),
            ],
            out_specs=pl.BlockSpec((tr, g * Wo), lambda i: (i, 0)),
        ),
        compiler_params=pltpu.CompilerParams(
            dimension_semantics=("parallel",),
            vmem_limit_bytes=_vmem_limit_bytes(fp, phys),
        ),
    )(x2, P)

    return out[:R2].reshape(N, C, Ho, Wo)


# ------------------------------ module forward -------------------------------

def downsample_forward(x, params, *, use_conv, channels, out_channels=None,
                       dims=2, padding=1, compute_dtype=jnp.bfloat16):
    """Mirrors Downsample.forward for dims=2 (NCHW input)."""
    assert dims == 2, "dims=2 path implemented"  # TODO(synk): dims=1/3 variants
    assert x.shape[1] == channels
    if use_conv:
        return downsample_conv2d(x, params["weight"], params["bias"],
                                 padding=padding, compute_dtype=compute_dtype)
    else:
        assert channels == (out_channels or channels)
        return downsample_avgpool2d(x)


# ---------------------------------- main -------------------------------------

if __name__ == "__main__":
    key = jax.random.PRNGKey(0)
    kx, kw, kb = jax.random.split(key, 3)

    N, C, H, W = 2, 4, 16, 16
    Cout = C  # out_channels defaults to channels

    x = jax.random.normal(kx, (N, C, H, W), dtype=jnp.float32)
    weight = jax.random.normal(kw, (Cout, C, 3, 3), dtype=jnp.float32) * 0.1
    bias = jax.random.normal(kb, (Cout,), dtype=jnp.float32) * 0.1
    params = {"weight": weight, "bias": bias}

    # --- conv path (use_conv=True), bf16 MXU operands / f32 accumulation
    y_conv = downsample_forward(x, params, use_conv=True, channels=C)
    y_conv = jax.block_until_ready(y_conv)
    assert y_conv.shape == (N, Cout, H // 2, W // 2)

    # tight check vs. a reference using the SAME bf16 operands (f32 accumulate)
    ref_bf16 = jax.lax.conv_general_dilated(
        x.astype(jnp.bfloat16), weight.astype(jnp.bfloat16),
        window_strides=(2, 2), padding=((1, 1), (1, 1)),
        dimension_numbers=("NCHW", "OIHW", "NCHW"),
        preferred_element_type=jnp.float32) + bias.reshape(1, -1, 1, 1)
    assert jnp.allclose(y_conv, ref_bf16, atol=2e-3, rtol=2e-3), float(
        jnp.max(jnp.abs(y_conv - ref_bf16)))

    # loose sanity check vs. the full-f32 reference (bf16 input rounding only)
    ref_f32 = jax.lax.conv_general_dilated(
        x, weight, window_strides=(2, 2), padding=((1, 1), (1, 1)),
        dimension_numbers=("NCHW", "OIHW", "NCHW")) + bias.reshape(1, -1, 1, 1)
    assert jnp.allclose(y_conv, ref_f32, atol=8e-2, rtol=8e-2), float(
        jnp.max(jnp.abs(y_conv - ref_f32)))

    # --- avg-pool path (use_conv=False), f32 accumulation
    y_pool = downsample_forward(x, params, use_conv=False, channels=C)
    y_pool = jax.block_until_ready(y_pool)
    assert y_pool.shape == (N, C, H // 2, W // 2)
    ref_pool = jax.lax.reduce_window(
        x, 0.0, jax.lax.add, (1, 1, 2, 2), (1, 1, 2, 2), "VALID") / 4.0
    assert jnp.allclose(y_pool, ref_pool, atol=1e-4, rtol=1e-4), float(
        jnp.max(jnp.abs(y_pool - ref_pool)))

    print("KERNEL_OK")
</pallas_src>

<mosaic_0001>
module attributes {stable_mosaic.version = 11 : i64} {
  func.func @kernel(%arg0: i32, %arg1: i32, %arg2: i32, %arg3: memref<1x9x8x128xbf16, #tpu.memory_space<vmem>>, %arg4: memref<1x9x8x128xbf16, #tpu.memory_space<vmem>>, %arg5: memref<1x9x8x128xbf16, #tpu.memory_space<vmem>>, %arg6: memref<1x9x8x128xbf16, #tpu.memory_space<vmem>>, %arg7: memref<1x9x8x128xbf16, #tpu.memory_space<vmem>>, %arg8: memref<1x9x8x128xbf16, #tpu.memory_space<vmem>>, %arg9: memref<3x3x128x128xbf16, #tpu.memory_space<vmem>>, %arg10: memref<1x128xf32, #tpu.memory_space<vmem>>, %arg11: memref<64x128xf32, #tpu.memory_space<vmem>>, %arg12: memref<64x128xf32, #tpu.memory_space<vmem>>) attributes {dimension_semantics = [#tpu.dimension_semantics<parallel>, #tpu.dimension_semantics<parallel>, #tpu.dimension_semantics<arbitrary>], iteration_bounds = array<i64: 2, 1, 1>, scalar_prefetch = 0 : i64, scratch_operands = 1 : i64, tpu.core_type = #tpu.core_type<tc>, window_params = [{transform_indices = @transform_0, window_bounds = array<i64: 1, 9, 8, 128>}, {transform_indices = @transform_1, window_bounds = array<i64: 1, 9, 8, 128>}, {transform_indices = @transform_2, window_bounds = array<i64: 1, 9, 8, 128>}, {transform_indices = @transform_3, window_bounds = array<i64: 1, 9, 8, 128>}, {transform_indices = @transform_4, window_bounds = array<i64: 1, 9, 8, 128>}, {transform_indices = @transform_5, window_bounds = array<i64: 1, 9, 8, 128>}, {transform_indices = @transform_6, window_bounds = array<i64: 3, 3, 128, 128>}, {transform_indices = @transform_7, window_bounds = array<i64: 1, 128>}, {transform_indices = @transform_8, window_bounds = array<i64: 64, 128>}]} {
    %c0_i32 = arith.constant 0 : i32
    %0 = arith.cmpi eq, %arg2, %c0_i32 : i32
    %1 = arith.extui %0 : i1 to i32
    %c0_i32_0 = arith.constant 0 : i32
    %2 = arith.cmpi ne, %1, %c0_i32_0 : i32
    scf.if %2 {
      %cst_116 = arith.constant 0.000000e+00 : f32
      %78 = vector.broadcast %cst_116 : f32 to vector<64x128xf32>
      %c0_117 = arith.constant 0 : index
      %c0_118 = arith.constant 0 : index
      %79 = vector.load %arg12[%c0_117, %c0_118] : memref<64x128xf32, #tpu.memory_space<vmem>>, vector<64x128xf32>
      tpu.vector_store %arg12[%c0_117, %c0_118], %78 {strides = array<i32>} : memref<64x128xf32, #tpu.memory_space<vmem>>, vector<64x128xf32>,
    } else {
    }
    %c0 = arith.constant 0 : index
    %c0_1 = arith.constant 0 : index
    %c0_2 = arith.constant 0 : index
    %c0_3 = arith.constant 0 : index
    %3 = vector.load %arg3[%c0, %c0_1, %c0_2, %c0_3] : memref<1x9x8x128xbf16, #tpu.memory_space<vmem>>, vector<1x8x8x128xbf16>
    %4 = vector.shape_cast %3 : vector<1x8x8x128xbf16> to vector<64x128xbf16>
    %c0_4 = arith.constant 0 : index
    %c0_5 = arith.constant 0 : index
    %5 = vector.load %arg12[%c0_4, %c0_5] : memref<64x128xf32, #tpu.memory_space<vmem>>, vector<64x128xf32>
    %c0_6 = arith.constant 0 : index
    %c0_7 = arith.constant 0 : index
    %c0_8 = arith.constant 0 : index
    %c0_9 = arith.constant 0 : index
    %6 = vector.load %arg9[%c0_6, %c0_7, %c0_8, %c0_9] : memref<3x3x128x128xbf16, #tpu.memory_space<vmem>>, vector<1x1x128x128xbf16>
    %7 = vector.shape_cast %6 : vector<1x1x128x128xbf16> to vector<128x128xbf16>
    %cst = arith.constant dense<0.000000e+00> : vector<64x128xf32>
    %8 = tpu.matmul %4, %7, %cst {dimension_numbers = #tpu.dot_dimension_numbers<[1], [0], [0], [1], [0, 0, 1, 1], [], []>} : vector<64x128xbf16>, vector<128x128xbf16>, vector<64x128xf32> -> vector<64x128xf32>
    %9 = arith.addf %5, %8 : vector<64x128xf32>
    %c0_10 = arith.constant 0 : index
    %c0_11 = arith.constant 0 : index
    %10 = vector.load %arg12[%c0_10, %c0_11] : memref<64x128xf32, #tpu.memory_space<vmem>>, vector<64x128xf32>
    tpu.vector_store %arg12[%c0_10, %c0_11], %9 {strides = array<i32>} : memref<64x128xf32, #tpu.memory_space<vmem>>, vector<64x128xf32>,
    %c0_12 = arith.constant 0 : index
    %c0_13 = arith.constant 0 : index
    %c0_14 = arith.constant 0 : index
    %c0_15 = arith.constant 0 : index
    %11 = vector.load %arg4[%c0_12, %c0_13, %c0_14, %c0_15] : memref<1x9x8x128xbf16, #tpu.memory_space<vmem>>, vector<1x8x8x128xbf16>
    %12 = vector.shape_cast %11 : vector<1x8x8x128xbf16> to vector<64x128xbf16>
    %c0_16 = arith.constant 0 : index
    %c0_17 = arith.constant 0 : index
    %13 = vector.load %arg12[%c0_16, %c0_17] : memref<64x128xf32, #tpu.memory_space<vmem>>, vector<64x128xf32>
    %c0_18 = arith.constant 0 : index
    %c1 = arith.constant 1 : index
    %c0_19 = arith.constant 0 : index
    %c0_20 = arith.constant 0 : index
    %14 = vector.load %arg9[%c0_18, %c1, %c0_19, %c0_20] : memref<3x3x128x128xbf16, #tpu.memory_space<vmem>>, vector<1x1x128x128xbf16>
    %15 = vector.shape_cast %14 : vector<1x1x128x128xbf16> to vector<128x128xbf16>
    %cst_21 = arith.constant dense<0.000000e+00> : vector<64x128xf32>
    %16 = tpu.matmul %12, %15, %cst_21 {dimension_numbers = #tpu.dot_dimension_numbers<[1], [0], [0], [1], [0, 0, 1, 1], [], []>} : vector<64x128xbf16>, vector<128x128xbf16>, vector<64x128xf32> -> vector<64x128xf32>
    %17 = arith.addf %13, %16 : vector<64x128xf32>
    %c0_22 = arith.constant 0 : index
    %c0_23 = arith.constant 0 : index
    %18 = vector.load %arg12[%c0_22, %c0_23] : memref<64x128xf32, #tpu.memory_space<vmem>>, vector<64x128xf32>
    tpu.vector_store %arg12[%c0_22, %c0_23], %17 {strides = array<i32>} : memref<64x128xf32, #tpu.memory_space<vmem>>, vector<64x128xf32>,
    %c0_24 = arith.constant 0 : index
    %c0_25 = arith.constant 0 : index
    %c0_26 = arith.constant 0 : index
    %c0_27 = arith.constant 0 : index
    %19 = vector.load %arg5[%c0_24, %c0_25, %c0_26, %c0_27] : memref<1x9x8x128xbf16, #tpu.memory_space<vmem>>, vector<1x8x8x128xbf16>
    %20 = vector.shape_cast %19 : vector<1x8x8x128xbf16> to vector<64x128xbf16>
    %c0_28 = arith.constant 0 : index
    %c0_29 = arith.constant 0 : index
    %21 = vector.load %arg12[%c0_28, %c0_29] : memref<64x128xf32, #tpu.memory_space<vmem>>, vector<64x128xf32>
    %c0_30 = arith.constant 0 : index
    %c2 = arith.constant 2 : index
    %c0_31 = arith.constant 0 : index
    %c0_32 = arith.constant 0 : index
    %22 = vector.load %arg9[%c0_30, %c2, %c0_31, %c0_32] : memref<3x3x128x128xbf16, #tpu.memory_space<vmem>>, vector<1x1x128x128xbf16>
    %23 = vector.shape_cast %22 : vector<1x1x128x128xbf16> to vector<128x128xbf16>
    %cst_33 = arith.constant dense<0.000000e+00> : vector<64x128xf32>
    %24 = tpu.matmul %20, %23, %cst_33 {dimension_numbers = #tpu.dot_dimension_numbers<[1], [0], [0], [1], [0, 0, 1, 1], [], []>} : vector<64x128xbf16>, vector<128x128xbf16>, vector<64x128xf32> -> vector<64x128xf32>
    %25 = arith.addf %21, %24 : vector<64x128xf32>
    %c0_34 = arith.constant 0 : index
    %c0_35 = arith.constant 0 : index
    %26 = vector.load %arg12[%c0_34, %c0_35] : memref<64x128xf32, #tpu.memory_space<vmem>>, vector<64x128xf32>
    tpu.vector_store %arg12[%c0_34, %c0_35], %25 {strides = array<i32>} : memref<64x128xf32, #tpu.memory_space<vmem>>, vector<64x128xf32>,
    %c0_36 = arith.constant 0 : index
    %c0_37 = arith.constant 0 : index
    %c0_38 = arith.constant 0 : index
    %c0_39 = arith.constant 0 : index
    %27 = vector.load %arg6[%c0_36, %c0_37, %c0_38, %c0_39] : memref<1x9x8x128xbf16, #tpu.memory_space<vmem>>, vector<1x8x8x128xbf16>
    %28 = vector.shape_cast %27 : vector<1x8x8x128xbf16> to vector<64x128xbf16>
    %c0_40 = arith.constant 0 : index
    %c0_41 = arith.constant 0 : index
    %29 = vector.load %arg12[%c0_40, %c0_41] : memref<64x128xf32, #tpu.memory_space<vmem>>, vector<64x128xf32>
    %c1_42 = arith.constant 1 : index
    %c0_43 = arith.constant 0 : index
    %c0_44 = arith.constant 0 : index
    %c0_45 = arith.constant 0 : index
    %30 = vector.load %arg9[%c1_42, %c0_43, %c0_44, %c0_45] : memref<3x3x128x128xbf16, #tpu.memory_space<vmem>>, vector<1x1x128x128xbf16>
    %31 = vector.shape_cast %30 : vector<1x1x128x128xbf16> to vector<128x128xbf16>
    %cst_46 = arith.constant dense<0.000000e+00> : vector<64x128xf32>
    %32 = tpu.matmul %28, %31, %cst_46 {dimension_numbers = #tpu.dot_dimension_numbers<[1], [0], [0], [1], [0, 0, 1, 1], [], []>} : vector<64x128xbf16>, vector<128x128xbf16>, vector<64x128xf32> -> vector<64x128xf32>
    %33 = arith.addf %29, %32 : vector<64x128xf32>
    %c0_47 = arith.constant 0 : index
    %c0_48 = arith.constant 0 : index
    %34 = vector.load %arg12[%c0_47, %c0_48] : memref<64x128xf32, #tpu.memory_space<vmem>>, vector<64x128xf32>
    tpu.vector_store %arg12[%c0_47, %c0_48], %33 {strides = array<i32>} : memref<64x128xf32, #tpu.memory_space<vmem>>, vector<64x128xf32>,
    %c0_49 = arith.constant 0 : index
    %c0_50 = arith.constant 0 : index
    %c0_51 = arith.constant 0 : index
    %c0_52 = arith.constant 0 : index
    %35 = vector.load %arg7[%c0_49, %c0_50, %c0_51, %c0_52] : memref<1x9x8x128xbf16, #tpu.memory_space<vmem>>, vector<1x8x8x128xbf16>
    %36 = vector.shape_cast %35 : vector<1x8x8x128xbf16> to vector<64x128xbf16>
    %c0_53 = arith.constant 0 : index
    %c0_54 = arith.constant 0 : index
    %37 = vector.load %arg12[%c0_53, %c0_54] : memref<64x128xf32, #tpu.memory_space<vmem>>, vector<64x128xf32>
    %c1_55 = arith.constant 1 : index
    %c1_56 = arith.constant 1 : index
    %c0_57 = arith.constant 0 : index
    %c0_58 = arith.constant 0 : index
    %38 = vector.load %arg9[%c1_55, %c1_56, %c0_57, %c0_58] : memref<3x3x128x128xbf16, #tpu.memory_space<vmem>>, vector<1x1x128x128xbf16>
    %39 = vector.shape_cast %38 : vector<1x1x128x128xbf16> to vector<128x128xbf16>
    %cst_59 = arith.constant dense<0.000000e+00> : vector<64x128xf32>
    %40 = tpu.matmul %36, %39, %cst_59 {dimension_numbers = #tpu.dot_dimension_numbers<[1], [0], [0], [1], [0, 0, 1, 1], [], []>} : vector<64x128xbf16>, vector<128x128xbf16>, vector<64x128xf32> -> vector<64x128xf32>
    %41 = arith.addf %37, %40 : vector<64x128xf32>
    %c0_60 = arith.constant 0 : index
    %c0_61 = arith.constant 0 : index
    %42 = vector.load %arg12[%c0_60, %c0_61] : memref<64x128xf32, #tpu.memory_space<vmem>>, vector<64x128xf32>
    tpu.vector_store %arg12[%c0_60, %c0_61], %41 {strides = array<i32>} : memref<64x128xf32, #tpu.memory_space<vmem>>, vector<64x128xf32>,
    %c0_62 = arith.constant 0 : index
    %c0_63 = arith.constant 0 : index
    %c0_64 = arith.constant 0 : index
    %c0_65 = arith.constant 0 : index
    %43 = vector.load %arg8[%c0_62, %c0_63, %c0_64, %c0_65] : memref<1x9x8x128xbf16, #tpu.memory_space<vmem>>, vector<1x8x8x128xbf16>
    %44 = vector.shape_cast %43 : vector<1x8x8x128xbf16> to vector<64x128xbf16>
    %c0_66 = arith.constant 0 : index
    %c0_67 = arith.constant 0 : index
    %45 = vector.load %arg12[%c0_66, %c0_67] : memref<64x128xf32, #tpu.memory_space<vmem>>, vector<64x128xf32>
    %c1_68 = arith.constant 1 : index
    %c2_69 = arith.constant 2 : index
    %c0_70 = arith.constant 0 : index
    %c0_71 = arith.constant 0 : index
    %46 = vector.load %arg9[%c1_68, %c2_69, %c0_70, %c0_71] : memref<3x3x128x128xbf16, #tpu.memory_space<vmem>>, vector<1x1x128x128xbf16>
    %47 = vector.shape_cast %46 : vector<1x1x128x128xbf16> to vector<128x128xbf16>
    %cst_72 = arith.constant dense<0.000000e+00> : vector<64x128xf32>
    %48 = tpu.matmul %44, %47, %cst_72 {dimension_numbers = #tpu.dot_dimension_numbers<[1], [0], [0], [1], [0, 0, 1, 1], [], []>} : vector<64x128xbf16>, vector<128x128xbf16>, vector<64x128xf32> -> vector<64x128xf32>
    %49 = arith.addf %45, %48 : vector<64x128xf32>
    %c0_73 = arith.constant 0 : index
    %c0_74 = arith.constant 0 : index
    %50 = vector.load %arg12[%c0_73, %c0_74] : memref<64x128xf32, #tpu.memory_space<vmem>>, vector<64x128xf32>
    tpu.vector_store %arg12[%c0_73, %c0_74], %49 {strides = array<i32>} : memref<64x128xf32, #tpu.memory_space<vmem>>, vector<64x128xf32>,
    %c0_75 = arith.constant 0 : index
    %c1_76 = arith.constant 1 : index
    %c0_77 = arith.constant 0 : index
    %c0_78 = arith.constant 0 : index
    %51 = vector.load %arg3[%c0_75, %c1_76, %c0_77, %c0_78] : memref<1x9x8x128xbf16, #tpu.memory_space<vmem>>, vector<1x8x8x128xbf16>
    %52 = vector.shape_cast %51 : vector<1x8x8x128xbf16> to vector<64x128xbf16>
    %c0_79 = arith.constant 0 : index
    %c0_80 = arith.constant 0 : index
    %53 = vector.load %arg12[%c0_79, %c0_80] : memref<64x128xf32, #tpu.memory_space<vmem>>, vector<64x128xf32>
    %c2_81 = arith.constant 2 : index
    %c0_82 = arith.constant 0 : index
    %c0_83 = arith.constant 0 : index
    %c0_84 = arith.constant 0 : index
    %54 = vector.load %arg9[%c2_81, %c0_82, %c0_83, %c0_84] : memref<3x3x128x128xbf16, #tpu.memory_space<vmem>>, vector<1x1x128x128xbf16>
    %55 = vector.shape_cast %54 : vector<1x1x128x128xbf16> to vector<128x128xbf16>
    %cst_85 = arith.constant dense<0.000000e+00> : vector<64x128xf32>
    %56 = tpu.matmul %52, %55, %cst_85 {dimension_numbers = #tpu.dot_dimension_numbers<[1], [0], [0], [1], [0, 0, 1, 1], [], []>} : vector<64x128xbf16>, vector<128x128xbf16>, vector<64x128xf32> -> vector<64x128xf32>
    %57 = arith.addf %53, %56 : vector<64x128xf32>
    %c0_86 = arith.constant 0 : index
    %c0_87 = arith.constant 0 : index
    %58 = vector.load %arg12[%c0_86, %c0_87] : memref<64x128xf32, #tpu.memory_space<vmem>>, vector<64x128xf32>
    tpu.vector_store %arg12[%c0_86, %c0_87], %57 {strides = array<i32>} : memref<64x128xf32, #tpu.memory_space<vmem>>, vector<64x128xf32>,
    %c0_88 = arith.constant 0 : index
    %c1_89 = arith.constant 1 : index
    %c0_90 = arith.constant 0 : index
    %c0_91 = arith.constant 0 : index
    %59 = vector.load %arg4[%c0_88, %c1_89, %c0_90, %c0_91] : memref<1x9x8x128xbf16, #tpu.memory_space<vmem>>, vector<1x8x8x128xbf16>
    %60 = vector.shape_cast %59 : vector<1x8x8x128xbf16> to vector<64x128xbf16>
    %c0_92 = arith.constant 0 : index
    %c0_93 = arith.constant 0 : index
    %61 = vector.load %arg12[%c0_92, %c0_93] : memref<64x128xf32, #tpu.memory_space<vmem>>, vector<64x128xf32>
    %c2_94 = arith.constant 2 : index
    %c1_95 = arith.constant 1 : index
    %c0_96 = arith.constant 0 : index
    %c0_97 = arith.constant 0 : index
    %62 = vector.load %arg9[%c2_94, %c1_95, %c0_96, %c0_97] : memref<3x3x128x128xbf16, #tpu.memory_space<vmem>>, vector<1x1x128x128xbf16>
    %63 = vector.shape_cast %62 : vector<1x1x128x128xbf16> to vector<128x128xbf16>
    %cst_98 = arith.constant dense<0.000000e+00> : vector<64x128xf32>
    %64 = tpu.matmul %60, %63, %cst_98 {dimension_numbers = #tpu.dot_dimension_numbers<[1], [0], [0], [1], [0, 0, 1, 1], [], []>} : vector<64x128xbf16>, vector<128x128xbf16>, vector<64x128xf32> -> vector<64x128xf32>
    %65 = arith.addf %61, %64 : vector<64x128xf32>
    %c0_99 = arith.constant 0 : index
    %c0_100 = arith.constant 0 : index
    %66 = vector.load %arg12[%c0_99, %c0_100] : memref<64x128xf32, #tpu.memory_space<vmem>>, vector<64x128xf32>
    tpu.vector_store %arg12[%c0_99, %c0_100], %65 {strides = array<i32>} : memref<64x128xf32, #tpu.memory_space<vmem>>, vector<64x128xf32>,
    %c0_101 = arith.constant 0 : index
    %c1_102 = arith.constant 1 : index
    %c0_103 = arith.constant 0 : index
    %c0_104 = arith.constant 0 : index
    %67 = vector.load %arg5[%c0_101, %c1_102, %c0_103, %c0_104] : memref<1x9x8x128xbf16, #tpu.memory_space<vmem>>, vector<1x8x8x128xbf16>
    %68 = vector.shape_cast %67 : vector<1x8x8x128xbf16> to vector<64x128xbf16>
    %c0_105 = arith.constant 0 : index
    %c0_106 = arith.constant 0 : index
    %69 = vector.load %arg12[%c0_105, %c0_106] : memref<64x128xf32, #tpu.memory_space<vmem>>, vector<64x128xf32>
    %c2_107 = arith.constant 2 : index
    %c2_108 = arith.constant 2 : index
    %c0_109 = arith.constant 0 : index
    %c0_110 = arith.constant 0 : index
    %70 = vector.load %arg9[%c2_107, %c2_108, %c0_109, %c0_110] : memref<3x3x128x128xbf16, #tpu.memory_space<vmem>>, vector<1x1x128x128xbf16>
    %71 = vector.shape_cast %70 : vector<1x1x128x128xbf16> to vector<128x128xbf16>
    %cst_111 = arith.constant dense<0.000000e+00> : vector<64x128xf32>
    %72 = tpu.matmul %68, %71, %cst_111 {dimension_numbers = #tpu.dot_dimension_numbers<[1], [0], [0], [1], [0, 0, 1, 1], [], []>} : vector<64x128xbf16>, vector<128x128xbf16>, vector<64x128xf32> -> vector<64x128xf32>
    %73 = arith.addf %69, %72 : vector<64x128xf32>
    %c0_112 = arith.constant 0 : index
    %c0_113 = arith.constant 0 : index
    %74 = vector.load %arg12[%c0_112, %c0_113] : memref<64x128xf32, #tpu.memory_space<vmem>>, vector<64x128xf32>
    tpu.vector_store %arg12[%c0_112, %c0_113], %73 {strides = array<i32>} : memref<64x128xf32, #tpu.memory_space<vmem>>, vector<64x128xf32>,
    %c0_i32_114 = arith.constant 0 : i32
    %75 = arith.cmpi eq, %arg2, %c0_i32_114 : i32
    %76 = arith.extui %75 : i1 to i32
    %c0_i32_115 = arith.constant 0 : i32
    %77 = arith.cmpi ne, %76, %c0_i32_115 : i32
    scf.if %77 {
      %c0_116 = arith.constant 0 : index
      %c0_117 = arith.constant 0 : index
      %78 = vector.load %arg12[%c0_116, %c0_117] : memref<64x128xf32, #tpu.memory_space<vmem>>, vector<64x128xf32>
      %c0_118 = arith.constant 0 : index
      %c0_119 = arith.constant 0 : index
      %79 = vector.load %arg10[%c0_118, %c0_119] : memref<1x128xf32, #tpu.memory_space<vmem>>, vector<1x128xf32>
      %80 = vector.broadcast %79 : vector<1x128xf32> to vector<64x128xf32>
      %81 = arith.addf %78, %80 : vector<64x128xf32>
      %c0_120 = arith.constant 0 : index
      %c0_121 = arith.constant 0 : index
      %82 = vector.load %arg11[%c0_120, %c0_121] : memref<64x128xf32, #tpu.memory_space<vmem>>, vector<64x128xf32>
      tpu.vector_store %arg11[%c0_120, %c0_121], %81 {strides = array<i32>} : memref<64x128xf32, #tpu.memory_space<vmem>>, vector<64x128xf32>,
    } else {
    }
    return
  }
  func.func @transform_0(%arg0: i32, %arg1: i32, %arg2: i32) -> (i32, i32, i32, i32) {
    %c0_i32 = arith.constant 0 : i32
    %c0_i32_0 = arith.constant 0 : i32
    %c0_i32_1 = arith.constant 0 : i32
    return %arg0, %c0_i32, %c0_i32_0, %arg2 : i32, i32, i32, i32
  }
  func.func @transform_1(%arg0: i32, %arg1: i32, %arg2: i32) -> (i32, i32, i32, i32) {
    %c0_i32 = arith.constant 0 : i32
    %c0_i32_0 = arith.constant 0 : i32
    %c0_i32_1 = arith.constant 0 : i32
    return %arg0, %c0_i32, %c0_i32_0, %arg2 : i32, i32, i32, i32
  }
  func.func @transform_2(%arg0: i32, %arg1: i32, %arg2: i32) -> (i32, i32, i32, i32) {
    %c0_i32 = arith.constant 0 : i32
    %c0_i32_0 = arith.constant 0 : i32
    %c0_i32_1 = arith.constant 0 : i32
    return %arg0, %c0_i32, %c0_i32_0, %arg2 : i32, i32, i32, i32
  }
  func.func @transform_3(%arg0: i32, %arg1: i32, %arg2: i32) -> (i32, i32, i32, i32) {
    %c0_i32 = arith.constant 0 : i32
    %c0_i32_0 = arith.constant 0 : i32
    %c0_i32_1 = arith.constant 0 : i32
    return %arg0, %c0_i32, %c0_i32_0, %arg2 : i32, i32, i32, i32
  }
  func.func @transform_4(%arg0: i32, %arg1: i32, %arg2: i32) -> (i32, i32, i32, i32) {
    %c0_i32 = arith.constant 0 : i32
    %c0_i32_0 = arith.constant 0 : i32
    %c0_i32_1 = arith.constant 0 : i32
    return %arg0, %c0_i32, %c0_i32_0, %arg2 : i32, i32, i32, i32
  }
  func.func @transform_5(%arg0: i32, %arg1: i32, %arg2: i32) -> (i32, i32, i32, i32) {
    %c0_i32 = arith.constant 0 : i32
    %c0_i32_0 = arith.constant 0 : i32
    %c0_i32_1 = arith.constant 0 : i32
    return %arg0, %c0_i32, %c0_i32_0, %arg2 : i32, i32, i32, i32
  }
  func.func @transform_6(%arg0: i32, %arg1: i32, %arg2: i32) -> (i32, i32, i32, i32) {
    %c0_i32 = arith.constant 0 : i32
    %c0_i32_0 = arith.constant 0 : i32
    %c0_i32_1 = arith.constant 0 : i32
    return %c0_i32, %c0_i32_0, %arg2, %arg1 : i32, i32, i32, i32
  }
  func.func @transform_7(%arg0: i32, %arg1: i32, %arg2: i32) -> (i32, i32) {
    %c0_i32 = arith.constant 0 : i32
    %c0_i32_0 = arith.constant 0 : i32
    return %c0_i32, %arg1 : i32, i32
  }
  func.func @transform_8(%arg0: i32, %arg1: i32, %arg2: i32) -> (i32, i32) {
    %c0_i32 = arith.constant 0 : i32
    return %arg0, %arg1 : i32, i32
  }
}

</mosaic_0001>

<bundles_post_ra>
// kernel: tpu_custom_call.1
= control target key start
LH: loop header
LB: loop body
LE: loop exit
PB: predicated region body
PF: predicated region fallthrough
CT: control target
= control target key end

     0   :  { %s3992_s0 = inlined_call_operand.hbm [shape: bf16[2,9,8,128], index: 0, kind: input, shape index: {}]   ;;  %s3993_s1 = inlined_call_operand.hbm [shape: bf16[2,9,8,128], index: 1, kind: input, shape index: {}]   ;;  %s3994_s2 = inlined_call_operand.hbm [shape: bf16[2,9,8,128], index: 2, kind: input, shape index: {}]   ;;  %s3995_s3 = inlined_call_operand.hbm [shape: bf16[2,9,8,128], index: 3, kind: input, shape index: {}]   ;;  %s3996_s4 = inlined_call_operand.hbm [shape: bf16[2,9,8,128], index: 4, kind: input, shape index: {}]   ;;  %s3997_s5 = inlined_call_operand.hbm [shape: bf16[2,9,8,128], index: 5, kind: input, shape index: {}]   ;;  %s3998_s6 = inlined_call_operand.hbm [shape: bf16[3,3,128,128], index: 6, kind: input, shape index: {}]   ;;  %s3999_s7 = inlined_call_operand.vmem [shape: f32[1,128], index: 7, kind: input, shape index: {}]   ;;  %s4000_s8 = inlined_call_operand.hbm [shape: f32[128,128], index: 8, kind: output, shape index: {}]  }
   0x1   :  { %4014 = sst [smem:[#allocation34_spill]] %s3993_s1 }
   0x2   :  { %4015 = sst [smem:[#allocation35_spill]] %s3995_s3 }
   0x3   :  { %4016 = sst [smem:[#allocation36_spill]] %s3998_s6 }
   0x4   :  { %4017 = sst [smem:[#allocation37_spill]] %s3999_s7 }
   0x5   :  { %4018 = sst [smem:[#allocation38_spill]] %s4000_s8 }
   0x6   :  { %13 = vsyncpa [#allocation4], 0 }
   0x7   :  { %15 = vsyncpa [#allocation4 + $0x1], 0 }
   0x8   :  { %16 = vsyncpa [#allocation7], 0 }
   0x9   :  { %18 = vsyncpa [#allocation7 + $0x1], 0 }
   0xa   :  { %19 = vsyncpa [#allocation10], 0 }
   0xb   :  { %21 = vsyncpa [#allocation10 + $0x1], 0 }
   0xc   :  { %22 = vsyncpa [#allocation13], 0 }
   0xd   :  { %24 = vsyncpa [#allocation13 + $0x1], 0 }
   0xe   :  { %25 = vsyncpa [#allocation5], 0 }
   0xf   :  { %27 = vsyncpa [#allocation5 + $0x1], 0  ;;  %s3634_s27 = smov 0   ;;  %s3636_s28 = smov 0  }
  0x10   :  { %s3638_s29 = smov 0   ;;  %s3640_s30 = smov 0  }
  0x11   :  { %s3642_s9 = smov 0   ;;  %s3644_s10 = smov 0  }
  0x12 LB: > { %4019 = sst [smem:[#allocation22_spill]] %s3555_s27  ;;  %s3665_s11 = sadd.s32 4294967295, %s3575_s10   ;;  %s3575_s10 = sphi %s3644_s10, %s33_s10   ;;  %s3571_s9 = sphi %s3642_s9, %s4062_s9   ;;  %s3567_s30 = sphi %s3640_s30, %s4061_s30   ;;  %s3563_s29 = sphi %s3638_s29, %s4065_s29   ;;  %s3559_s28 = sphi %s3636_s28, %s4064_s28   ;;  %s3555_s27 = sphi %s3634_s27, %s4063_s27  }
  0x13   : > { %4020 = sst [smem:[#allocation23_spill]] %s3567_s30  ;;  %s2569_s12 = sadd.s32 4294967294, %s3575_s10  }
  0x14   : > { %4021 = sst [smem:[#allocation24_spill]] %s3571_s9  ;;  %s52_s13 = sadd.s32 1, %s3571_s9 }
  0x15   : > { %4022 = sst [smem:[#allocation25_spill]] %s3575_s10  ;;  %s61_s14 = sadd.s32 1, %s3563_s29 }
  0x16   : > { %p54_p0 = scmp.ge.s32.totalorder %s52_s13, 2  ;;  %p68_p1 = scmp.ne.s32.totalorder %s3563_s29, %s3559_s28 }
  0x17   : > { %p69_p2 = scmp.eq.s32.totalorder %s3575_s10, 0  ;;  %p74_p3 = scmp.ne.s32.totalorder %s3559_s28, %s3555_s27 }
  0x18   : > { %s4067_s13 = smov (%p54_p0, %s52_s13), 0  ;;  %p4001_p5 = scmp.eq.s32.totalorder %s3665_s11, 0 }
  0x19   : > { %4023 = sst [smem:[#allocation26_spill]] %s4067_s13  ;;  %p3677_p4 = por %p69_p2, %p68_p1 }
  0x1a   : > { %s56_s16 = ssub.s32 %s3571_s9, %s4067_s13  ;;  %p294_p6 = scmp.eq.s32.totalorder %s3665_s11, 1 }
  0x1b   : > { %p59_p7 = scmp.eq.s32.totalorder %s56_s16, 0  ;;  %p3687_p8 = por %p4001_p5, %p74_p3 }
  0x1c   : > { %p3691_p9 = por %p294_p6, %p68_p1  ;;  %p300_p10 = scmp.eq.s32.totalorder %s2569_s12, 1 }
  0x1d   : > { %s3696_s19 = scalar_select %p59_p7, %s3563_s29, %s61_s14  }
  0x1e   : > { %s4026_s18 = scalar_select %p3691_p9, 1, 0 }
  0x1f   : > { %4028 = sst [smem:[#allocation28_spill]] %s3696_s19  ;;  %p3698_p11 = por %p300_p10, %p74_p3 }
  0x20   : > { %4027 = sst [smem:[#allocation27_spill]] %s4026_s18  ;;  %p2570_p12 = scmp.ge.s32.totalorder %s3575_s10, 1 }
  0x21   : > { %s4029_s20 = scalar_select %p3698_p11, 1, 0 }
  0x22   : > { %p307_p13 = scmp.lt.s32.totalorder %s3575_s10, 3  ;;  %s3577_s22 = smov [#allocation14]  }
  0x23   : > { %4030 = sst [smem:[#allocation29_spill]] %s4029_s20  ;;  %s323_s23 = sshll.u32 %s3577_s22, 4  ;;  %s324_s23 = int_to_ptr.vmem [resolvable:$true] %s323_s23 }
  0x24   : > { %p3704_p0 = pnand %p2570_p12, %p307_p13  ;;  %p3121_p6 = scmp.lt.s32.totalorder %s3575_s10, 2 }
  0x25   : > { %s4003_s24 = sand.u32 1, %s3563_s29   ;;  %s3730_s14 = smul.u32 576, %s3571_s9 }
  0x26   : > { %p3093_p1 = pneg %p3704_p0  ;;  %s3721_s26 = smul.u32 36, %s4003_s24 }
  0x27   : > { %p3725_p7 = pnand %p3121_p6, %p3677_p4  ;;  %s3733_s16 = sand.u32 1, %s3575_s10  }
  0x28   : > { %p3715_p3 = pnand %p3093_p1, %p4001_p5  ;;  %s3296_s22 = scalar_lea.vmem %s324_s23, 9216 }
  0x29   : > { %p3297_p12 = scmp.ne.s32.totalorder %s324_s23, %s3296_s22  ;;  %p3304_p2 = scmp.lt.s32.totalorder %s324_s23, %s324_s23 }
  0x2a   : > { %p3287_p10 = pneg %p3715_p3  ;;  %p3305_p5 = scmp.lt.s32.totalorder %s3296_s22, %s3296_s22 }
  0x2c   : > { %p3299_p13 = pnand %p3297_p12, %p3287_p10  ;;  %p3306_p11 = por %p3305_p5, %p3304_p2 }
  0x2e   : > { %p3300_p1 = pneg %p3299_p13 }
  0x30   : > { %p3307_p9 = pnand %p3306_p11, %p3300_p1 }
  0x32   : > { %3310 = shalt.err (!%p3307_p9)
}
  0x33   : > { %s3578_s15 = smov 64   ;;  %s3579_s24 = smov 4  }
  0x34   : > { %s4034_s6 = sld [smem:[#allocation36_spill]]  ;;  %s369_s20 = scalar_lea.vmem [#allocation6], %s3721_s26 }
  0x35   : > { %s4035_s1 = sld [smem:[#allocation34_spill]]  ;;  %s377_s27 = sshll.u32 %s369_s20, 4  ;;  %s378_s27 = int_to_ptr.vmem [resolvable:$true] %s377_s27 }
  0x36   : > { %s4013_s8 = scalar_lea.sflag [#allocation7], %s3733_s16  ;;  %p3753_p4 = pneg %p3725_p7 }
  0x37   : > { %s3324_s25 = scalar_lea.vmem %s378_s27, 576  ;;  %s3580_s9 = smov [#allocation6]  }
  0x38   : > { %p3325_p5 = scmp.ne.s32.totalorder %s378_s27, %s3324_s25  ;;  %s3329_s13 = sshll.u32 %s3580_s9, 4  ;;  %s3330_s13 = int_to_ptr.vmem [resolvable:$false] %s3329_s13 }
  0x39   : > { %s3331_s19 = scalar_lea.vmem %s3330_s13, 1152  ;;  %p3332_p2 = scmp.lt.s32.totalorder %s378_s27, %s3330_s13 }
  0x3a   : > { %3096 = dma.hbm_to_vmem [thread:$0]  (!%p3715_p3), %s4034_s6, 9216, %s324_s23, [#allocation13], %s3578_s15, %s3578_s15, %s3579_s24  }
  0x3b   : > { %s376_s10 = scalar_lea.hbm %s4035_s1, %s3730_s14  ;;  %p3327_p9 = pnand %p3325_p5, %p3753_p4 }
  0x3c   : > { %p3333_p6 = scmp.lt.s32.totalorder %s3331_s19, %s3324_s25 }
  0x3d   : > { %p3328_p11 = pneg %p3327_p9 }
  0x3e   : > { %p3334_p3 = por %p3333_p6, %p3332_p2 }
  0x40   : > { %p3335_p10 = pnand %p3334_p3, %p3328_p11 }
  0x42   : > { %3338 = shalt.err (!%p3335_p10)
}
  0x43   : > { %3103 = dma.hbm_to_vmem [thread:$0]  (!%p3725_p7), %s376_s10, 576, %s378_s27, %s4013_s8, %s3578_s15, %s3578_s15, %s3579_s24  }
  0x44   : > { %s4037_s3 = sld [smem:[#allocation35_spill]]  ;;  %s413_s25 = scalar_lea.vmem [#allocation9], %s3721_s26 }
  0x45   : > { %s421_s9 = sshll.u32 %s413_s25, 4  ;;  %s410_s13 = scalar_lea.sflag [#allocation10], %s3733_s16  ;;  %s422_s9 = int_to_ptr.vmem [resolvable:$true] %s421_s9 }
  0x46   : > { %s3352_s19 = scalar_lea.vmem %s422_s9, 576  ;;  %s3581_s1 = smov [#allocation9]  }
  0x47   : > { %p3353_p12 = scmp.ne.s32.totalorder %s422_s9, %s3352_s19  ;;  %s3357_s6 = sshll.u32 %s3581_s1, 4  ;;  %s3358_s6 = int_to_ptr.vmem [resolvable:$false] %s3357_s6 }
  0x48   : > { %s3359_s30 = scalar_lea.vmem %s3358_s6, 1152  ;;  %p3360_p5 = scmp.lt.s32.totalorder %s422_s9, %s3358_s6 }
  0x49   : > { %p3355_p13 = pnand %p3353_p12, %p3753_p4  ;;  %p3361_p9 = scmp.lt.s32.totalorder %s3359_s30, %s3352_s19 }
  0x4a   : > { %s420_s22 = scalar_lea.hbm %s4037_s3, %s3730_s14 }
  0x4b   : > { %p3356_p1 = pneg %p3355_p13  ;;  %p3362_p11 = por %p3361_p9, %p3360_p5 }
  0x4d   : > { %p3363_p2 = pnand %p3362_p11, %p3356_p1 }
  0x4f   : > { %3366 = shalt.err (!%p3363_p2)
}
  0x50   : > { %3109 = dma.hbm_to_vmem [thread:$0]  (!%p3725_p7), %s420_s22, 576, %s422_s9, %s410_s13, %s3578_s15, %s3578_s15, %s3579_s24  }
  0x51   : > { %s354_s6 = scalar_lea.hbm %s3992_s0, %s3730_s14  ;;  %s347_s30 = scalar_lea.vmem [#allocation3], %s3721_s26 }
  0x52   : > { %s355_s10 = sshll.u32 %s347_s30, 4  ;;  %s398_s25 = scalar_lea.hbm %s3994_s2, %s3730_s14  ;;  %s356_s10 = int_to_ptr.vmem [resolvable:$true] %s355_s10 }
  0x53   : > { %s4038_s19 = sand.u32 1, %s3563_s29   ;;  %s3380_s3 = scalar_lea.vmem %s356_s10, 576 }
  0x54   : > { %s344_s8 = scalar_lea.sflag [#allocation4], %s4038_s19  ;;  %p3381_p6 = scmp.ne.s32.totalorder %s356_s10, %s3380_s3 }
  0x55   : > { %s3582_s7 = smov [#allocation3]  }
  0x56   : > { %p3383_p3 = pnand %p3381_p6, %p3753_p4  ;;  %s3385_s22 = sshll.u32 %s3582_s7, 4  ;;  %s3386_s22 = int_to_ptr.vmem [resolvable:$false] %s3385_s22 }
  0x57   : > { %s3387_s9 = scalar_lea.vmem %s3386_s22, 1152  ;;  %p3388_p12 = scmp.lt.s32.totalorder %s356_s10, %s3386_s22 }
  0x58   : > { %p3384_p10 = pneg %p3383_p3  ;;  %p3389_p13 = scmp.lt.s32.totalorder %s3387_s9, %s3380_s3 }
  0x5a   : > { %p3390_p1 = por %p3389_p13, %p3388_p12 }
  0x5c   : > { %p3391_p5 = pnand %p3390_p1, %p3384_p10 }
  0x5e   : > { %3394 = shalt.err (!%p3391_p5)
}
  0x5f   : > { %3100 = dma.hbm_to_vmem [thread:$0]  (!%p3725_p7), %s354_s6, 576, %s356_s10, %s344_s8, %s3578_s15, %s3578_s15, %s3579_s24  }
  0x60   : > { %s391_s1 = scalar_lea.vmem [#allocation8], %s3721_s26  ;;  %s442_s20 = scalar_lea.hbm %s3996_s4, %s3730_s14 }
  0x61   : > { %s399_s27 = sshll.u32 %s391_s1, 4  ;;  %s3583_s23 = smov [#allocation8]   ;;  %s400_s27 = int_to_ptr.vmem [resolvable:$true] %s399_s27 }
  0x62   : > { %s3408_s3 = scalar_lea.vmem %s400_s27, 576  ;;  %s3413_s19 = sshll.u32 %s3583_s23, 4  ;;  %s3414_s19 = int_to_ptr.vmem [resolvable:$false] %s3413_s19 }
  0x63   : > { %p3409_p9 = scmp.ne.s32.totalorder %s400_s27, %s3408_s3  ;;  %s3415_s22 = scalar_lea.vmem %s3414_s19, 1152 }
  0x64   : > { %p3416_p6 = scmp.lt.s32.totalorder %s400_s27, %s3414_s19  ;;  %p3417_p3 = scmp.lt.s32.totalorder %s3415_s22, %s3408_s3 }
  0x65   : > { %p3411_p11 = pnand %p3409_p9, %p3753_p4 }
  0x66   : > { %p3418_p10 = por %p3417_p3, %p3416_p6 }
  0x67   : > { %p3412_p2 = pneg %p3411_p11 }
  0x69   : > { %p3419_p12 = pnand %p3418_p10, %p3412_p2 }
  0x6b   : > { %3422 = shalt.err (!%p3419_p12)
}
  0x6c   : > { %s4039_s8 = scalar_lea.sflag [#allocation7], %s3733_s16  ;;  %s435_s9 = scalar_lea.vmem [#allocation11], %s3721_s26 }
  0x6d   : > { %3106 = dma.hbm_to_vmem [thread:$0]  (!%p3725_p7), %s398_s25, 576, %s400_s27, %s4039_s8, %s3578_s15, %s3578_s15, %s3579_s24  }
  0x6e   : > { %s443_s1 = sshll.u32 %s435_s9, 4  ;;  %s3584_s30 = smov [#allocation11]   ;;  %s444_s1 = int_to_ptr.vmem [resolvable:$true] %s443_s1 }
  0x6f   : > { %s3436_s7 = scalar_lea.vmem %s444_s1, 576  ;;  %s3441_s3 = sshll.u32 %s3584_s30, 4  ;;  %s3442_s3 = int_to_ptr.vmem [resolvable:$false] %s3441_s3 }
  0x70   : > { %p3437_p13 = scmp.ne.s32.totalorder %s444_s1, %s3436_s7  ;;  %s3443_s23 = scalar_lea.vmem %s3442_s3, 1152 }
  0x71   : > { %p3444_p9 = scmp.lt.s32.totalorder %s444_s1, %s3442_s3  ;;  %p3445_p11 = scmp.lt.s32.totalorder %s3443_s23, %s3436_s7 }
  0x72   : > { %p3439_p1 = pnand %p3437_p13, %p3753_p4 }
  0x73   : > { %p3446_p2 = por %p3445_p11, %p3444_p9 }
  0x74   : > { %p3440_p5 = pneg %p3439_p1 }
  0x76   : > { %p3447_p6 = pnand %p3446_p2, %p3440_p5 }
  0x78   : > { %3450 = shalt.err (!%p3447_p6)
}
  0x79   : > { %3112 = dma.hbm_to_vmem [thread:$0]  (!%p3725_p7), %s442_s20, 576, %s444_s1, %s410_s13, %s3578_s15, %s3578_s15, %s3579_s24  }
  0x7a   : > { %s464_s8 = scalar_lea.hbm %s3997_s5, %s3730_s14  ;;  %s457_s6 = scalar_lea.vmem [#allocation12], %s3721_s26 }
  0x7b   : > { %s465_s10 = sshll.u32 %s457_s6, 4  ;;  %s454_s9 = scalar_lea.sflag [#allocation13], %s3733_s16  ;;  %s466_s10 = int_to_ptr.vmem [resolvable:$true] %s465_s10 }
  0x7c   : > { %s3464_s7 = scalar_lea.vmem %s466_s10, 576  ;;  %s3585_s30 = smov [#allocation12]  }
  0x7d   : > { %p3465_p3 = scmp.ne.s32.totalorder %s466_s10, %s3464_s7  ;;  %s3469_s3 = sshll.u32 %s3585_s30, 4  ;;  %s3470_s3 = int_to_ptr.vmem [resolvable:$false] %s3469_s3 }
  0x7e   : > { %s3471_s23 = scalar_lea.vmem %s3470_s3, 1152  ;;  %p3472_p13 = scmp.lt.s32.totalorder %s466_s10, %s3470_s3 }
  0x7f   : > { %p3467_p10 = pnand %p3465_p3, %p3753_p4  ;;  %p3473_p1 = scmp.lt.s32.totalorder %s3471_s23, %s3464_s7 }
  0x81   : > { %p3468_p12 = pneg %p3467_p10  ;;  %p3474_p5 = por %p3473_p1, %p3472_p13 }
  0x83   : > { %p3475_p9 = pnand %p3474_p5, %p3468_p12 }
  0x85   : > { %3478 = shalt.err (!%p3475_p9)
}
  0x86   : > { %3115 = dma.hbm_to_vmem [thread:$0]  (!%p3725_p7), %s464_s8, 576, %s466_s10, %s454_s9, %s3578_s15, %s3578_s15, %s3579_s24  }
  0x87   : > { %477 = sbr.rel (%p3704_p0) target bundleno = 536 (0x218), region = 52 }
  0x8c   : > { %s3849_s18 = sand.u32 1, %s3559_s28  }
  0x8d   : > { %s3074_s26 = smul.u32 36, %s3849_s18  ;;  %s480_s14 = scalar_lea.sflag [#allocation4], %s3849_s18 }
  0x8f   : > { %s3853_s16 = scalar_lea.vmem [#allocation3], %s3074_s26 }
  0x90   : > { %3530 = dma.done.wait (%p3687_p8), %s480_s14, 576  }
  0x91   : > { %3532 = vsyncadd (%p3687_p8), %s480_s14, 4294966720  ;;  %s488_s24 = sand.u32 1, %s3665_s11   ;;  %s3860_s12 = scalar_lea.vmem [#allocation6], %s3074_s26 }
  0x92   : > { %s489_s21 = scalar_lea.sflag [#allocation7], %s488_s24 }
  0x93   : > { %3534 = dma.done.wait (%p3687_p8), %s489_s21, 1152  }
  0x94   : > { %3536 = vsyncadd (%p3687_p8), %s489_s21, 4294966144  ;;  %s3866_s15 = scalar_lea.vmem [#allocation8], %s3074_s26  ;;  %s507_s13 = scalar_lea.sflag [#allocation10], %s488_s24 }
  0x95   : > { %s3868_s20 = scalar_lea.vmem [#allocation9], %s3074_s26 }
  0x96   : > { %3538 = dma.done.wait (%p3687_p8), %s507_s13, 1152  }
  0x97   : > { %3540 = vsyncadd (%p3687_p8), %s507_s13, 4294966144  ;;  %s3874_s1 = scalar_lea.vmem [#allocation11], %s3074_s26  ;;  %s525_s25 = scalar_lea.sflag [#allocation13], %s488_s24 }
  0x98   : > { %s3876_s27 = scalar_lea.vmem [#allocation12], %s3074_s26 }
  0x99   : > { %3542 = dma.done.wait (%p3687_p8), %s525_s25, 576  }
  0x9a   : > { %3544 = vsyncadd (%p3687_p8), %s525_s25, 4294966720  ;;  %p4040_p0 = scmp.eq.s32.totalorder %s3665_s11, 0 }
  0x9c   : > { %3546 = dma.done.wait (%p4040_p0), [#allocation13], 9216   ;;  %p4041_p7 = pmov %p4040_p0 }
  0x9d   : > { %v3177_v0 = vld [vmem:[#allocation14 + $0x38] sm:$0xff]   ;;  %v3179_v2 = vld [vmem:[#allocation14 + $0x30] sm:$0xff]   ;;  %v3181_v4 = vld [vmem:[#allocation14 + $0x28] sm:$0xff]   ;;  %s2582_s11 = sshll.u32 %s3849_s18, 6  ;;  %s4047_s22 = sld [smem:[#allocation37_spill]] }
  0x9e   : > { %3548 = vsyncadd (%p4041_p7), [#allocation13], 4294958080  ;;  %v3178_v1 = vld [vmem:[#allocation14 + $0x78] sm:$0xff]   ;;  %2830 = vmatprep.subr.bf16.mxu0 %v3177_v0  ;;  %v3180_v3 = vld [vmem:[#allocation14 + $0x70] sm:$0xff]   ;;  %s4050_s8 = sld [smem:[#allocation23_spill]]  ;;  %s592_s6 = scalar_lea.vmem [#allocation15], %s2582_s11 }
  0x9f   : > { %2854 = vmatprep.subr.bf16.mxu1 %v3178_v1  ;;  %2831 = vmatpush3.bf16.msra.mxu0 %v3177_v0  ;;  %v3182_v5 = vld [vmem:[#allocation14 + $0x68] sm:$0xff]   ;;  %v3183_v6 = vld [vmem:[#allocation14 + $0x20] sm:$0xff]   ;;  %v3185_v8 = vld [vmem:[#allocation14 + $0x18] sm:$0xff]   ;;  %s2336_s10 = sshll.u32 %s592_s6, 4  ;;  %s4052_s7 = sld [smem:[#allocation27_spill]]  ;;  %s3939_s10 = int_to_ptr.vmem [resolvable:$true] %s2336_s10 }
  0xa0   : > { %2855 = vmatpush3.bf16.msra.mxu1 %v3178_v1  ;;  %2832 = vmatprep.subr.bf16.mxu0 %v3179_v2  ;;  %v3184_v7 = vld [vmem:[#allocation14 + $0x60] sm:$0xff]   ;;  %v3186_v9 = vld [vmem:[#allocation14 + $0x58] sm:$0xff]   ;;  %v3187_v10 = vld [vmem:[#allocation14 + $0x10] sm:$0xff]   ;;  %s4053_s23 = sld [smem:[#allocation38_spill]]  ;;  %s2322_s14 = scalar_lea.sflag [#allocation5], %s3849_s18 }
  0xa1   : > { %2856 = vmatprep.subr.bf16.mxu1 %v3180_v3  ;;  %v3188_v11 = vld [vmem:[#allocation14 + $0x50] sm:$0xff]   ;;  %v3194_v13 = vld [vmem:[%s3860_s12] sm:$0xff]   ;;  %v3189_v14 = vld [vmem:[#allocation14 + $0x8] sm:$0xff]   ;;  %s3586_s24 = smov [#allocation15]  }
  0xa2   : > { %v3193_v12 = vld [vmem:[%s3853_s16] sm:$0xff]   ;;  %2870 = vmatprep.mubr.bf16.mxu1 %v3194_v13  ;;  %v3190_v15 = vld [vmem:[#allocation14 + $0x48] sm:$0xff]   ;;  %v3191_v16 = vld [vmem:[#allocation14] sm:$0xff]   ;;  %s3483_s21 = sshll.u32 %s3586_s24, 4  ;;  %s3484_s21 = int_to_ptr.vmem [resolvable:$false] %s3483_s21 }
  0xa3   : > { %2833 = vmatpush3.bf16.msra.mxu0 %v3179_v2  ;;  %2846 = vmatprep.mubr.bf16.mxu0 %v3193_v12  ;;  %v3192_v17 = vld [vmem:[#allocation14 + $0x40] sm:$0xff]   ;;  %v3197_v19 = vld [vmem:[#allocation14 + $0xb8] sm:$0xff]   ;;  %v3199_v22 = vld [vmem:[#allocation14 + $0xb0] sm:$0xff]   ;;  %p3486_p6 = scmp.lt.s32.totalorder %s3939_s10, %s3484_s21 }
  0xa4   : > { %2857 = vmatpush3.bf16.msra.mxu1 %v3180_v3  ;;  %2834 = vmatprep.subr.bf16.mxu0 %v3181_v4  ;;  %v3195_v18 = vld [vmem:[%s3853_s16 + $0x8] sm:$0xff]   ;;  %v3196_v21 = vld [vmem:[%s3860_s12 + $0x8] sm:$0xff]   ;;  %v3200_v23 = vld [vmem:[#allocation14 + $0xf0] sm:$0xff]   ;;  %s2721_s9 = sshll.u32 %s4050_s8, 10 }
  0xa5   : > { %2858 = vmatprep.subr.bf16.mxu1 %v3182_v5  ;;  %v3198_v20 = vld [vmem:[#allocation14 + $0xf8] sm:$0xff]   ;;  %v3207_v24 = vld [vmem:[%s3853_s16 + $0x10] sm:$0xff]   ;;  %v3208_v25 = vld [vmem:[%s3860_s12 + $0x10] sm:$0xff]   ;;  %p4054_p4 = scmp.ne.s32.totalorder %s4052_s7, 0 }
  0xa6   : > { %v3201_v26 = vld [vmem:[#allocation14 + $0xa8] sm:$0xff]   ;;  %v3203_v28 = vld [vmem:[#allocation14 + $0xa0] sm:$0xff]   ;;  %v3210_v30 = vld [vmem:[%s3860_s12 + $0x18] sm:$0xff]   ;;  %s3944_s26 = scalar_lea.hbm %s4053_s23, %s2721_s9 }
  0xa7   : > { %2835 = vmatpush3.bf16.msra.mxu0 %v3181_v4  ;;  %v3202_v27 = vld [vmem:[#allocation14 + $0xe8] sm:$0xff]   ;;  %v3204_v31 = vld [vmem:[#allocation14 + $0xe0] sm:$0xff]   ;;  %v3205_v34 = vld [vmem:[#allocation14 + $0x98] sm:$0xff]  }
  0xa8   : > { %2859 = vmatpush3.bf16.msra.mxu1 %v3182_v5  ;;  %2836 = vmatprep.subr.bf16.mxu0 %v3183_v6  ;;  %v3209_v29 = vld [vmem:[%s3853_s16 + $0x18] sm:$0xff]   ;;  %v3217_v32 = vld [vmem:[%s3866_s15] sm:$0xff]   ;;  %v3206_v35 = vld [vmem:[#allocation14 + $0xd8] sm:$0xff]  }
  0xa9   : > { %2860 = vmatprep.subr.bf16.mxu1 %v3184_v7  ;;  %v3218_v33 = vld [vmem:[%s3868_s20] sm:$0xff]   ;;  %v3215_v40 = vld [vmem:[#allocation14 + $0x80] sm:$0xff]   ;;  %v3221_v43 = vld [vmem:[#allocation14 + $0x138] sm:$0xff]  }
  0xaa   : > { %v3211_v36 = vld [vmem:[#allocation14 + $0x90] sm:$0xff]   ;;  %v3213_v38 = vld [vmem:[#allocation14 + $0x88] sm:$0xff]   ;;  %v3216_v41 = vld [vmem:[#allocation14 + $0xc0] sm:$0xff]  }
  0xab   : > { %2837 = vmatpush3.bf16.msra.mxu0 %v3183_v6  ;;  %v3212_v37 = vld [vmem:[#allocation14 + $0xd0] sm:$0xff]   ;;  %v3214_v39 = vld [vmem:[#allocation14 + $0xc8] sm:$0xff]   ;;  %v3222_v44 = vld [vmem:[#allocation14 + $0x178] sm:$0xff]  }
  0xac   : > { %2861 = vmatpush3.bf16.msra.mxu1 %v3184_v7  ;;  %2838 = vmatprep.subr.bf16.mxu0 %v3185_v8  ;;  %v3219_v42 = vld [vmem:[%s3866_s15 + $0x8] sm:$0xff]   ;;  %v3220_v45 = vld [vmem:[%s3868_s20 + $0x8] sm:$0xff]   ;;  %v3229_v49 = vld [vmem:[%s3868_s20 + $0x10] sm:$0xff]  }
  0xad   : > { %2862 = vmatprep.subr.bf16.mxu1 %v3186_v9  ;;  %v3223_v46 = vld [vmem:[#allocation14 + $0x130] sm:$0xff]   ;;  %v3226_v50 = vld [vmem:[%s3866_s15 + $0x18] sm:$0xff]   ;;  %v3227_v51 = vld [vmem:[#allocation14 + $0x128] sm:$0xff]  }
  0xae   : > { %v3224_v47 = vld [vmem:[#allocation14 + $0x170] sm:$0xff]   ;;  %v3228_v52 = vld [vmem:[#allocation14 + $0x168] sm:$0xff]   ;;  %v3231_v54 = vld [vmem:[#allocation14 + $0x120] sm:$0xff]  }
  0xaf   : > { %2839 = vmatpush3.bf16.msra.mxu0 %v3185_v8  ;;  %v3225_v48 = vld [vmem:[%s3866_s15 + $0x10] sm:$0xff]   ;;  %v3230_v53 = vld [vmem:[%s3868_s20 + $0x18] sm:$0xff]   ;;  %v3242_v57 = vld [vmem:[%s3876_s27] sm:$0xff]  }
  0xb0   : > { %2863 = vmatpush3.bf16.msra.mxu1 %v3186_v9  ;;  %2840 = vmatprep.subr.bf16.mxu0 %v3187_v10  ;;  %v3232_v55 = vld [vmem:[#allocation14 + $0x160] sm:$0xff]   ;;  %v3241_v56 = vld [vmem:[%s3874_s1] sm:$0xff]   ;;  %v3237_v62 = vld [vmem:[#allocation14 + $0x108] sm:$0xff]  }
  0xb1   : > { %2864 = vmatprep.subr.bf16.mxu1 %v3188_v11  ;;  %v3233_v58 = vld [vmem:[#allocation14 + $0x118] sm:$0xff]   ;;  %v3235_v60 = vld [vmem:[#allocation14 + $0x110] sm:$0xff]   ;;  %v3238_v63 = vld [vmem:[#allocation14 + $0x148] sm:$0xff]  }
  0xb2   : > { %v3234_v59 = vld [vmem:[#allocation14 + $0x158] sm:$0xff]   ;;  %v3236_v61 = vld [vmem:[#allocation14 + $0x150] sm:$0xff]   ;;  %v3239_v0 = vld [vmem:[#allocation14 + $0x100] sm:$0xff]  }
  0xb3   : > { %2841 = vmatpush3.bf16.msra.mxu0 %v3187_v10  ;;  %v3240_v1 = vld [vmem:[#allocation14 + $0x140] sm:$0xff]   ;;  %v3245_v3 = vld [vmem:[#allocation14 + $0x1b8] sm:$0xff]   ;;  %v3247_v6 = vld [vmem:[#allocation14 + $0x1b0] sm:$0xff]  }
  0xb4   : > { %2865 = vmatpush3.bf16.msra.mxu1 %v3188_v11  ;;  %2842 = vmatprep.subr.bf16.mxu0 %v3189_v14  ;;  %v3243_v2 = vld [vmem:[%s3874_s1 + $0x8] sm:$0xff]   ;;  %v3244_v5 = vld [vmem:[%s3876_s27 + $0x8] sm:$0xff]   ;;  %v3248_v7 = vld [vmem:[#allocation14 + $0x1f0] sm:$0xff]  }
  0xb5   : > { %2866 = vmatprep.subr.bf16.mxu1 %v3190_v15  ;;  %v3246_v4 = vld [vmem:[#allocation14 + $0x1f8] sm:$0xff]   ;;  %v3249_v8 = vld [vmem:[%s3874_s1 + $0x10] sm:$0xff]   ;;  %v3253_v9 = vld [vmem:[%s3876_s27 + $0x10] sm:$0xff]  }
  0xb6   : > { %v3250_v10 = vld [vmem:[%s3874_s1 + $0x18] sm:$0xff]   ;;  %v3254_v13 = vld [vmem:[%s3876_s27 + $0x18] sm:$0xff]  }
  0xb7   : > { %2843 = vmatpush3.bf16.msra.mxu0 %v3189_v14  ;;  %v3251_v11 = vld [vmem:[#allocation14 + $0x1a8] sm:$0xff]   ;;  %v3255_v14 = vld [vmem:[#allocation14 + $0x1a0] sm:$0xff]  }
  0xb8   : > { %2867 = vmatpush3.bf16.msra.mxu1 %v3190_v15  ;;  %2844 = vmatprep.subr.bf16.mxu0 %v3191_v16  ;;  %v3252_v12 = vld [vmem:[#allocation14 + $0x1e8] sm:$0xff]   ;;  %v3256_v15 = vld [vmem:[#allocation14 + $0x1e0] sm:$0xff]  }
  0xb9   : > { %2868 = vmatprep.subr.bf16.mxu1 %v3192_v17 }
  0xbb   : > { %2845 = vmatpush3.bf16.msra.mxu0 %v3191_v16  ;;  %v3265_v16 = vld [vmem:[%s3853_s16 + $0x4] sm:$0xff]  }
  0xbc   : > { %2869 = vmatpush3.bf16.msra.mxu1 %v3192_v17  ;;  %2878 = vmatprep.subr.bf16.mxu0 %v3197_v19  ;;  %v3266_v17 = vld [vmem:[%s3860_s12 + $0x4] sm:$0xff]  }
  0xbd   : > { %2902 = vmatprep.subr.bf16.mxu1 %v3198_v20 }
  0xbe   : > { %2847 = vmatmul.mubr.bf16.vlgmr.msra.gmra.mxu0 %v3195_v18  ;;  %v3257_v18 = vld [vmem:[#allocation14 + $0x198] sm:$0xff]  }
  0xbf   : > { %2871 = vmatmul.mubr.bf16.vlgmr.msra.gmra.mxu1 %v3196_v21  ;;  %2879 = vmatpush3.bf16.msra.mxu0 %v3197_v19  ;;  %v3258_v19 = vld [vmem:[#allocation14 + $0x1d8] sm:$0xff]   ;;  %v3260_v21 = vld [vmem:[#allocation14 + $0x1d0] sm:$0xff]  }
  0xc0   : > { %2903 = vmatpush3.bf16.msra.mxu1 %v3198_v20  ;;  %2880 = vmatprep.subr.bf16.mxu0 %v3199_v22  ;;  %v3259_v20 = vld [vmem:[#allocation14 + $0x190] sm:$0xff]  }
  0xc1   : > { %2904 = vmatprep.subr.bf16.mxu1 %v3200_v23  ;;  %2850 = vmatprep.mubr.bf16.mxu0 %v3207_v24  ;;  %v3263_v24 = vld [vmem:[#allocation14 + $0x180] sm:$0xff]  }
  0xc2   : > { %2874 = vmatprep.mubr.bf16.mxu1 %v3208_v25  ;;  %v3264_v25 = vld [vmem:[#allocation14 + $0x1c0] sm:$0xff]  }
  0xc3   : > { %2881 = vmatpush3.bf16.msra.mxu0 %v3199_v22  ;;  %v3261_v22 = vld [vmem:[#allocation14 + $0x188] sm:$0xff]  }
  0xc4   : > { %2905 = vmatpush3.bf16.msra.mxu1 %v3200_v23  ;;  %2882 = vmatprep.subr.bf16.mxu0 %v3201_v26  ;;  %v3262_v23 = vld [vmem:[#allocation14 + $0x1c8] sm:$0xff]  }
  0xc5   : > { %2906 = vmatprep.subr.bf16.mxu1 %v3202_v27 }
  0xc6   : > { %2851 = vmatmul.mubr.bf16.gmra.mxu0 %v3209_v29  ;;  %v3270_v29 = vld [vmem:[#allocation14 + $0x230] sm:$0xff]  }
  0xc7   : > { %2883 = vmatpush3.bf16.msra.mxu0 %v3201_v26  ;;  %2875 = vmatmul.mubr.bf16.gmra.mxu1 %v3210_v30  ;;  %v3269_v26 = vld [vmem:[#allocation14 + $0x238] sm:$0xff]   ;;  %v3271_v30 = vld [vmem:[%s3853_s16 + $0x14] sm:$0xff]  }
  0xc8   : > { %2907 = vmatpush3.bf16.msra.mxu1 %v3202_v27  ;;  %2884 = vmatprep.subr.bf16.mxu0 %v3203_v28  ;;  %v3267_v27 = vld [vmem:[%s3853_s16 + $0xc] sm:$0xff]  }
  0xc9   : > { %2908 = vmatprep.subr.bf16.mxu1 %v3204_v31  ;;  %2894 = vmatprep.mubr.bf16.mxu0 %v3217_v32  ;;  %v3273_v32 = vld [vmem:[#allocation14 + $0x228] sm:$0xff]  }
  0xca   : > { %2918 = vmatprep.mubr.bf16.mxu1 %v3218_v33  ;;  %v3272_v33 = vld [vmem:[%s3853_s16 + $0x1c] sm:$0xff]   ;;  %s3479_s16 = scalar_lea.vmem %s3939_s10, 1024 }
  0xcb   : > { %2885 = vmatpush3.bf16.msra.mxu0 %v3203_v28  ;;  %v3268_v28 = vld [vmem:[%s3860_s12 + $0xc] sm:$0xff]   ;;  %p3480_p8 = scmp.ne.s32.totalorder %s3939_s10, %s3479_s16 }
  0xcc   : > { %2909 = vmatpush3.bf16.msra.mxu1 %v3204_v31  ;;  %2886 = vmatprep.subr.bf16.mxu0 %v3205_v34  ;;  %v3274_v31 = vld [vmem:[%s3860_s12 + $0x14] sm:$0xff]  }
  0xcd   : > { %2910 = vmatprep.subr.bf16.mxu1 %v3206_v35  ;;  %p3481_p11 = pnand %p3480_p8, %p4054_p4 }
  0xcf   : > { %2887 = vmatpush3.bf16.msra.mxu0 %v3205_v34  ;;  %v3275_v34 = vld [vmem:[%s3860_s12 + $0x1c] sm:$0xff]   ;;  %p3482_p2 = pneg %p3481_p11  ;;  %s3485_s12 = scalar_lea.vmem %s3484_s21, 2048 }
  0xd0   : > { %2911 = vmatpush3.bf16.msra.mxu1 %v3206_v35  ;;  %2888 = vmatprep.subr.bf16.mxu0 %v3211_v36  ;;  %v3276_v35 = vld [vmem:[#allocation14 + $0x220] sm:$0xff]   ;;  %p3487_p3 = scmp.lt.s32.totalorder %s3485_s12, %s3479_s16 }
  0xd1   : > { %2912 = vmatprep.subr.bf16.mxu1 %v3212_v37 }
  0xd2   : > { %p3488_p10 = por %p3487_p3, %p3486_p6 }
  0xd3   : > { %2889 = vmatpush3.bf16.msra.mxu0 %v3211_v36  ;;  %v3281_v36 = vld [vmem:[%s3866_s15 + $0x4] sm:$0xff]  }
  0xd4   : > { %2913 = vmatpush3.bf16.msra.mxu1 %v3212_v37  ;;  %2890 = vmatprep.subr.bf16.mxu0 %v3213_v38  ;;  %v3282_v37 = vld [vmem:[%s3866_s15 + $0x14] sm:$0xff]   ;;  %p3489_p12 = pnand %p3488_p10, %p3482_p2 }
  0xd5   : > { %2914 = vmatprep.subr.bf16.mxu1 %v3214_v39 }
  0xd7   : > { %2891 = vmatpush3.bf16.msra.mxu0 %v3213_v38  ;;  %v3277_v38 = vld [vmem:[#allocation14 + $0x218] sm:$0xff]  }
  0xd8   : > { %2915 = vmatpush3.bf16.msra.mxu1 %v3214_v39  ;;  %2892 = vmatprep.subr.bf16.mxu0 %v3215_v40  ;;  %v3278_v39 = vld [vmem:[#allocation14 + $0x210] sm:$0xff]  }
  0xd9   : > { %2916 = vmatprep.subr.bf16.mxu1 %v3216_v41 }
  0xdb   : > { %2893 = vmatpush3.bf16.msra.mxu0 %v3215_v40  ;;  %v3279_v40 = vld [vmem:[#allocation14 + $0x208] sm:$0xff]  }
  0xdc   : > { %2917 = vmatpush3.bf16.msra.mxu1 %v3216_v41  ;;  %2926 = vmatprep.subr.bf16.mxu0 %v3221_v43  ;;  %v3280_v41 = vld [vmem:[#allocation14 + $0x200] sm:$0xff]  }
  0xdd   : > { %2950 = vmatprep.subr.bf16.mxu1 %v3222_v44 }
  0xde   : > { %2895 = vmatmul.mubr.bf16.vlgmr.msra.gmra.mxu0 %v3219_v42  ;;  %v3283_v42 = vld [vmem:[%s3866_s15 + $0xc] sm:$0xff]  }
  0xdf   : > { %2919 = vmatmul.mubr.bf16.vlgmr.msra.gmra.mxu1 %v3220_v45  ;;  %2927 = vmatpush3.bf16.msra.mxu0 %v3221_v43  ;;  %v3284_v43 = vld [vmem:[%s3866_s15 + $0x1c] sm:$0xff]  }
  0xe0   : > { %2951 = vmatpush3.bf16.msra.mxu1 %v3222_v44  ;;  %2928 = vmatprep.subr.bf16.mxu0 %v3223_v46 }
  0xe1   : > { %2952 = vmatprep.subr.bf16.mxu1 %v3224_v47  ;;  %2898 = vmatprep.mubr.bf16.mxu0 %v3225_v48 }
  0xe2   : > { %2922 = vmatprep.mubr.bf16.mxu1 %v3229_v49 }
  0xe3   : > { %2929 = vmatpush3.bf16.msra.mxu0 %v3223_v46 }
  0xe4   : > { %2953 = vmatpush3.bf16.msra.mxu1 %v3224_v47  ;;  %2930 = vmatprep.subr.bf16.mxu0 %v3227_v51 }
  0xe5   : > { %2954 = vmatprep.subr.bf16.mxu1 %v3228_v52 }
  0xe6   : > { %2899 = vmatmul.mubr.bf16.gmra.mxu0 %v3226_v50 }
  0xe7   : > { %2931 = vmatpush3.bf16.msra.mxu0 %v3227_v51  ;;  %2923 = vmatmul.mubr.bf16.gmra.mxu1 %v3230_v53 }
  0xe8   : > { %2955 = vmatpush3.bf16.msra.mxu1 %v3228_v52  ;;  %2932 = vmatprep.subr.bf16.mxu0 %v3231_v54 }
  0xe9   : > { %2956 = vmatprep.subr.bf16.mxu1 %v3232_v55  ;;  %2942 = vmatprep.mubr.bf16.mxu0 %v3241_v56 }
  0xea   : > { %2966 = vmatprep.mubr.bf16.mxu1 %v3242_v57 }
  0xeb   : > { %2933 = vmatpush3.bf16.msra.mxu0 %v3231_v54 }
  0xec   : > { %2957 = vmatpush3.bf16.msra.mxu1 %v3232_v55  ;;  %2934 = vmatprep.subr.bf16.mxu0 %v3233_v58 }
  0xed   : > { %2958 = vmatprep.subr.bf16.mxu1 %v3234_v59 }
  0xef   : > { %2935 = vmatpush3.bf16.msra.mxu0 %v3233_v58 }
  0xf0   : > { %2959 = vmatpush3.bf16.msra.mxu1 %v3234_v59  ;;  %2936 = vmatprep.subr.bf16.mxu0 %v3235_v60 }
  0xf1   : > { %2960 = vmatprep.subr.bf16.mxu1 %v3236_v61 }
  0xf3   : > { %2937 = vmatpush3.bf16.msra.mxu0 %v3235_v60 }
  0xf4   : > { %2961 = vmatpush3.bf16.msra.mxu1 %v3236_v61  ;;  %2938 = vmatprep.subr.bf16.mxu0 %v3237_v62 }
  0xf5   : > { %2962 = vmatprep.subr.bf16.mxu1 %v3238_v63 }
  0xf7   : > { %2939 = vmatpush3.bf16.msra.mxu0 %v3237_v62 }
  0xf8   : > { %2963 = vmatpush3.bf16.msra.mxu1 %v3238_v63  ;;  %2940 = vmatprep.subr.bf16.mxu0 %v3239_v0 }
  0xf9   : > { %2964 = vmatprep.subr.bf16.mxu1 %v3240_v1 }
  0xfb   : > { %2941 = vmatpush3.bf16.msra.mxu0 %v3239_v0 }
  0xfc   : > { %2965 = vmatpush3.bf16.msra.mxu1 %v3240_v1  ;;  %2974 = vmatprep.subr.bf16.mxu0 %v3245_v3 }
  0xfd   : > { %2998 = vmatprep.subr.bf16.mxu1 %v3246_v4 }
  0xfe   : > { %2943 = vmatmul.mubr.bf16.vlgmr.msra.gmra.mxu0 %v3243_v2 }
  0xff   : > { %2967 = vmatmul.mubr.bf16.vlgmr.msra.gmra.mxu1 %v3244_v5  ;;  %2975 = vmatpush3.bf16.msra.mxu0 %v3245_v3 }
 0x100   : > { %2999 = vmatpush3.bf16.msra.mxu1 %v3246_v4  ;;  %2976 = vmatprep.subr.bf16.mxu0 %v3247_v6 }
 0x101   : > { %3000 = vmatprep.subr.bf16.mxu1 %v3248_v7  ;;  %2946 = vmatprep.mubr.bf16.mxu0 %v3249_v8 }
 0x102   : > { %2970 = vmatprep.mubr.bf16.mxu1 %v3253_v9 }
 0x103   : > { %2977 = vmatpush3.bf16.msra.mxu0 %v3247_v6 }
 0x104   : > { %3001 = vmatpush3.bf16.msra.mxu1 %v3248_v7  ;;  %2978 = vmatprep.subr.bf16.mxu0 %v3251_v11 }
 0x105   : > { %3002 = vmatprep.subr.bf16.mxu1 %v3252_v12 }
 0x106   : > { %2947 = vmatmul.mubr.bf16.gmra.mxu0 %v3250_v10 }
 0x107   : > { %2979 = vmatpush3.bf16.msra.mxu0 %v3251_v11  ;;  %2971 = vmatmul.mubr.bf16.gmra.mxu1 %v3254_v13 }
 0x108   : > { %3003 = vmatpush3.bf16.msra.mxu1 %v3252_v12  ;;  %2980 = vmatprep.subr.bf16.mxu0 %v3255_v14 }
 0x109   : > { %3004 = vmatprep.subr.bf16.mxu1 %v3256_v15  ;;  %2990 = vmatprep.mubr.bf16.mxu0 %v3265_v16 }
 0x10a   : > { %3014 = vmatprep.mubr.bf16.mxu1 %v3266_v17 }
 0x10b   : > { %2981 = vmatpush3.bf16.msra.mxu0 %v3255_v14 }
 0x10c   : > { %3005 = vmatpush3.bf16.msra.mxu1 %v3256_v15  ;;  %2982 = vmatprep.subr.bf16.mxu0 %v3257_v18 }
 0x10d   : > { %3006 = vmatprep.subr.bf16.mxu1 %v3258_v19 }
 0x10f   : > { %2983 = vmatpush3.bf16.msra.mxu0 %v3257_v18 }
 0x110   : > { %3007 = vmatpush3.bf16.msra.mxu1 %v3258_v19  ;;  %2984 = vmatprep.subr.bf16.mxu0 %v3259_v20 }
 0x111   : > { %3008 = vmatprep.subr.bf16.mxu1 %v3260_v21 }
 0x113   : > { %2985 = vmatpush3.bf16.msra.mxu0 %v3259_v20 }
 0x114   : > { %3009 = vmatpush3.bf16.msra.mxu1 %v3260_v21  ;;  %2986 = vmatprep.subr.bf16.mxu0 %v3261_v22 }
 0x115   : > { %3010 = vmatprep.subr.bf16.mxu1 %v3262_v23 }
 0x117   : > { %2987 = vmatpush3.bf16.msra.mxu0 %v3261_v22 }
 0x118   : > { %3011 = vmatpush3.bf16.msra.mxu1 %v3262_v23  ;;  %2988 = vmatprep.subr.bf16.mxu0 %v3263_v24 }
 0x119   : > { %3012 = vmatprep.subr.bf16.mxu1 %v3264_v25 }
 0x11b   : > { %2989 = vmatpush3.bf16.msra.mxu0 %v3263_v24 }
 0x11c   : > { %3013 = vmatpush3.bf16.msra.mxu1 %v3264_v25  ;;  %3022 = vmatprep.subr.bf16.mxu0 %v3269_v26 }
 0x11d   : > { %3046 = vmatprep.subr.bf16.mxu1 %v3269_v26 }
 0x11e   : > { %2991 = vmatmul.mubr.bf16.vlgmr.msra.gmra.mxu0 %v3267_v27 }
 0x11f   : > { %3015 = vmatmul.mubr.bf16.vlgmr.msra.gmra.mxu1 %v3268_v28  ;;  %3023 = vmatpush3.bf16.msra.mxu0 %v3269_v26 }
 0x120   : > { %3054 = vmatpush3.bf16.msra.mxu1 %v3269_v26  ;;  %3024 = vmatprep.subr.bf16.mxu0 %v3270_v29 }
 0x121   : > { %3047 = vmatprep.subr.bf16.mxu1 %v3270_v29  ;;  %2994 = vmatprep.mubr.bf16.mxu0 %v3271_v30 }
 0x122   : > { %3018 = vmatprep.mubr.bf16.mxu1 %v3274_v31 }
 0x123   : > { %3025 = vmatpush3.bf16.msra.mxu0 %v3270_v29 }
 0x124   : > { %3055 = vmatpush3.bf16.msra.mxu1 %v3270_v29  ;;  %3026 = vmatprep.subr.bf16.mxu0 %v3273_v32 }
 0x125   : > { %3048 = vmatprep.subr.bf16.mxu1 %v3273_v32 }
 0x126   : > { %2995 = vmatmul.mubr.bf16.gmra.mxu0 %v3272_v33 }
 0x127   : > { %3027 = vmatpush3.bf16.msra.mxu0 %v3273_v32  ;;  %3019 = vmatmul.mubr.bf16.gmra.mxu1 %v3275_v34 }
 0x128   : > { %3056 = vmatpush3.bf16.msra.mxu1 %v3273_v32  ;;  %3028 = vmatprep.subr.bf16.mxu0 %v3276_v35 }
 0x129   : > { %3049 = vmatprep.subr.bf16.mxu1 %v3276_v35  ;;  %3038 = vmatprep.mubr.bf16.mxu0 %v3281_v36 }
 0x12a   : > { %3042 = vmatprep.mubr.bf16.mxu1 %v3282_v37 }
 0x12b   : > { %3029 = vmatpush3.bf16.msra.mxu0 %v3276_v35 }
 0x12c   : > { %3057 = vmatpush3.bf16.msra.mxu1 %v3276_v35  ;;  %3030 = vmatprep.subr.bf16.mxu0 %v3277_v38 }
 0x12d   : > { %3050 = vmatprep.subr.bf16.mxu1 %v3277_v38 }
 0x12f   : > { %3031 = vmatpush3.bf16.msra.mxu0 %v3277_v38 }
 0x130   : > { %3058 = vmatpush3.bf16.msra.mxu1 %v3277_v38  ;;  %3032 = vmatprep.subr.bf16.mxu0 %v3278_v39 }
 0x131   : > { %3051 = vmatprep.subr.bf16.mxu1 %v3278_v39 }
 0x133   : > { %3033 = vmatpush3.bf16.msra.mxu0 %v3278_v39 }
 0x134   : > { %3059 = vmatpush3.bf16.msra.mxu1 %v3278_v39  ;;  %3034 = vmatprep.subr.bf16.mxu0 %v3279_v40 }
 0x135   : > { %3052 = vmatprep.subr.bf16.mxu1 %v3279_v40 }
 0x137   : > { %3035 = vmatpush3.bf16.msra.mxu0 %v3279_v40 }
 0x138   : > { %3060 = vmatpush3.bf16.msra.mxu1 %v3279_v40  ;;  %3036 = vmatprep.subr.bf16.mxu0 %v3280_v41 }
 0x139   : > { %3053 = vmatprep.subr.bf16.mxu1 %v3280_v41 }
 0x13b   : > { %3037 = vmatpush3.bf16.msra.mxu0 %v3280_v41 }
 0x13c   : > { %3061 = vmatpush3.bf16.msra.mxu1 %v3280_v41 }
 0x13e   : > { %3039 = vmatmul.mubr.bf16.vlgmr.msra.gmra.mxu0 %v3283_v42 }
 0x13f   : > { %3043 = vmatmul.mubr.bf16.vlgmr.msra.gmra.mxu1 %v3284_v43 }
 0x17e   : > { %v2848_v44 = vpop.f32.mrf.mxu0 }
 0x17f   : > { %v2872_v46 = vpop.f32.mrf.mxu1 }
 0x180   : > { %v749_v45 = vpop.f32.mrf.mxu0  ;;  %v968_v33 = vadd.f32 %v2872_v46, %v2848_v44 }
 0x181   : > { %v935_v48 = vpop.f32.mrf.mxu1 }
 0x182   : > { %v2849_v47 = vpop.f32.mrf.mxu0  ;;  %v966_v37 = vadd.f32 %v935_v48, %v749_v45 }
 0x183   : > { %v2873_v51 = vpop.f32.mrf.mxu1 }
 0x184   : > { %v752_v49 = vpop.f32.mrf.mxu0  ;;  %v969_v41 = vadd.f32 %v2873_v51, %v2849_v47 }
 0x185   : > { %v938_v53 = vpop.f32.mrf.mxu1 }
 0x186   : > { %v2852_v50 = vpop.f32.mrf.mxu0  ;;  %v967_v46 = vadd.f32 %v938_v53, %v752_v49 }
 0x187   : > { %v2876_v54 = vpop.f32.mrf.mxu1 }
 0x188   : > { %v765_v52 = vpop.f32.mrf.mxu0  ;;  %v972_v35 = vadd.f32 %v2876_v54, %v2852_v50 }
 0x189   : > { %v951_v56 = vpop.f32.mrf.mxu1 }
 0x18a   : > { %v2853_v55 = vpop.f32.mrf.mxu0  ;;  %v970_v39 = vadd.f32 %v951_v56, %v765_v52 }
 0x18b   : > { %v2877_v59 = vpop.f32.mrf.mxu1 }
 0x18c   : > { %v768_v57 = vpop.f32.mrf.mxu0 }
 0x18d   : > { %v954_v61 = vpop.f32.mrf.mxu1 }
 0x18e   : > { %v971_v45 = vadd.f32 %v954_v61, %v768_v57 }
 0x19e   : > { %v2896_v58 = vpop.f32.mrf.mxu0 }
 0x19f   : > { %v2920_v62 = vpop.f32.mrf.mxu1  ;;  %v1154_v38 = vadd.f32 %v2896_v58, %v968_v33 }
 0x1a0   : > { %v1121_v60 = vpop.f32.mrf.mxu0 }
 0x1a1   : > { %v1307_v0 = vpop.f32.mrf.mxu1  ;;  %v1152_v42 = vadd.f32 %v1121_v60, %v966_v37 }
 0x1a2   : > { %v2897_v63 = vpop.f32.mrf.mxu0 }
 0x1a3   : > { %v2921_v2 = vpop.f32.mrf.mxu1  ;;  %v1155_v50 = vadd.f32 %v2897_v63, %v969_v41  ;;  %v1338_v58 = vadd.f32 %v1307_v0, %v1152_v42 }
 0x1a4   : > { %v1124_v1 = vpop.f32.mrf.mxu0 }
 0x1a5   : > { %v1310_v4 = vpop.f32.mrf.mxu1  ;;  %v1153_v52 = vadd.f32 %v1124_v1, %v967_v46  ;;  %v1341_v60 = vadd.f32 %v2921_v2, %v1155_v50 }
 0x1a6   : > { %v2900_v3 = vpop.f32.mrf.mxu0 }
 0x1a7   : > { %v2924_v6 = vpop.f32.mrf.mxu1  ;;  %v1158_v40 = vadd.f32 %v2900_v3, %v972_v35 }
 0x1a8   : > { %v1137_v5 = vpop.f32.mrf.mxu0 }
 0x1a9   : > { %v1323_v8 = vpop.f32.mrf.mxu1  ;;  %v1344_v48 = vadd.f32 %v2924_v6, %v1158_v40 }
 0x1aa   : > { %v2901_v7 = vpop.f32.mrf.mxu0 }
 0x1ab   : > { %v2925_v10 = vpop.f32.mrf.mxu1 }
 0x1ac   : > { %v1140_v9 = vpop.f32.mrf.mxu0 }
 0x1ad   : > { %v1326_v12 = vpop.f32.mrf.mxu1  ;;  %v1157_v35 = vadd.f32 %v1140_v9, %v971_v45 }
 0x1be   : > { %v2944_v11 = vpop.f32.mrf.mxu0 }
 0x1bf   : > { %v2968_v14 = vpop.f32.mrf.mxu1 }
 0x1c0   : > { %v1493_v13 = vpop.f32.mrf.mxu0 }
 0x1c1   : > { %v1679_v16 = vpop.f32.mrf.mxu1  ;;  %v1524_v37 = vadd.f32 %v1493_v13, %v1338_v58 }
 0x1c2   : > { %v2945_v15 = vpop.f32.mrf.mxu0 }
 0x1c3   : > { %v2969_v18 = vpop.f32.mrf.mxu1  ;;  %v1527_v53 = vadd.f32 %v2945_v15, %v1341_v60  ;;  %v1710_v6 = vadd.f32 %v1679_v16, %v1524_v37 }
 0x1c4   : > { %v1496_v17 = vpop.f32.mrf.mxu0 }
 0x1c5   : > { %v3922_v20 = vpop.f32.mrf.mxu1  ;;  %v1713_v2 = vadd.f32 %v2969_v18, %v1527_v53 }
 0x1c6   : > { %v2948_v19 = vpop.f32.mrf.mxu0  ;;  %4042 = vst [vmem:[#allocation30_spill] sm:$0xff] %v3922_v20  ;;  %v973_v20 = vadd.f32 %v2877_v59, %v2853_v55 }
 0x1c7   : > { %v2972_v21 = vpop.f32.mrf.mxu1  ;;  %v1530_v47 = vadd.f32 %v2948_v19, %v1344_v48 }
 0x1c8   : > { %v1509_v22 = vpop.f32.mrf.mxu0  ;;  %v1159_v33 = vadd.f32 %v2901_v7, %v973_v20 }
 0x1c9   : > { %v1695_v23 = vpop.f32.mrf.mxu1  ;;  %v1716_v63 = vadd.f32 %v2972_v21, %v1530_v47 }
 0x1ca   : > { %v2949_v24 = vpop.f32.mrf.mxu0  ;;  %v1345_v55 = vadd.f32 %v2925_v10, %v1159_v33 }
 0x1cb   : > { %v2973_v25 = vpop.f32.mrf.mxu1 }
 0x1cc   : > { %v1512_v26 = vpop.f32.mrf.mxu0  ;;  %v1531_v57 = vadd.f32 %v2949_v24, %v1345_v55 }
 0x1cd   : > { %v1698_v28 = vpop.f32.mrf.mxu1 }
 0x1ce   : > { %v1717_v19 = vadd.f32 %v2973_v25, %v1531_v57 }
 0x1de   : > { %v2992_v27 = vpop.f32.mrf.mxu0 }
 0x1df   : > { %v3016_v29 = vpop.f32.mrf.mxu1 }
 0x1e0   : > { %v1866_v30 = vpop.f32.mrf.mxu0 }
 0x1e1   : > { %v3924_v31 = vpop.f32.mrf.mxu1  ;;  %v1897_v13 = vadd.f32 %v1866_v30, %v1710_v6 }
 0x1e2   : > { %4043 = vst [vmem:[#allocation31_spill] sm:$0xff] %v3924_v31  ;;  %v2993_v32 = vpop.f32.mrf.mxu0  ;;  %v1156_v31 = vadd.f32 %v1137_v5, %v970_v39  ;;  %v1339_v5 = vadd.f32 %v1310_v4, %v1153_v52  ;;  %v4046_v4 = vld [vmem:[#allocation30_spill] sm:$0xff] }
 0x1e3   : > { %v3926_v34 = vpop.f32.mrf.mxu1 }
 0x1e4   : > { %4044 = vst [vmem:[#allocation32_spill] sm:$0xff] %v3926_v34  ;;  %v1869_v36 = vpop.f32.mrf.mxu0  ;;  %v1340_v34 = vadd.f32 %v2920_v62, %v1154_v38  ;;  %v1342_v3 = vadd.f32 %v1323_v8, %v1156_v31  ;;  %v1343_v62 = vadd.f32 %v1326_v12, %v1157_v35  ;;  %v1525_v0 = vadd.f32 %v1496_v17, %v1339_v5 }
 0x1e5   : > { %v3928_v43 = vpop.f32.mrf.mxu1  ;;  %v1900_v12 = vadd.f32 %v2993_v32, %v1713_v2 }
 0x1e6   : > { %4045 = vst [vmem:[#allocation33_spill] sm:$0xff] %v3928_v43  ;;  %v2996_v44 = vpop.f32.mrf.mxu0  ;;  %v1526_v56 = vadd.f32 %v2944_v11, %v1340_v34  ;;  %v1528_v59 = vadd.f32 %v1509_v22, %v1342_v3  ;;  %v1529_v9 = vadd.f32 %v1512_v26, %v1343_v62 }
 0x1e7   : > { %v3020_v54 = vpop.f32.mrf.mxu1  ;;  %v1903_v11 = vadd.f32 %v2996_v44, %v1716_v63 }
 0x1e8   : > { %v1882_v51 = vpop.f32.mrf.mxu0  ;;  %v1712_v49 = vadd.f32 %v2968_v14, %v1526_v56  ;;  %v1714_v8 = vadd.f32 %v1695_v23, %v1528_v59  ;;  %v1711_v14 = vadd.f32 %v4046_v4, %v1525_v0  ;;  %v1715_v22 = vadd.f32 %v1698_v28, %v1529_v9  ;;  %v2715_v23 = vld [vmem:[%s4047_s22] ss:$0 sm:$0xff] }
 0x1e9   : > { %v2069_v43 = vpop.f32.mrf.mxu1  ;;  %v2090_v16 = vadd.f32 %v3020_v54, %v1903_v11  ;;  %v4048_v26 = vld [vmem:[#allocation31_spill] sm:$0xff] }
 0x1ea   : > { %v2997_v61 = vpop.f32.mrf.mxu0  ;;  %v1899_v1 = vadd.f32 %v2992_v27, %v1712_v49  ;;  %v1901_v10 = vadd.f32 %v1882_v51, %v1714_v8  ;;  %v2084_v18 = vadd.f32 %v4048_v26, %v1897_v13  ;;  %v1898_v27 = vadd.f32 %v1869_v36, %v1711_v14 }
 0x1eb   : > { %v3021_v7 = vpop.f32.mrf.mxu1  ;;  %v1904_v24 = vadd.f32 %v2997_v61, %v1717_v19  ;;  %v4049_v32 = vld [vmem:[#allocation32_spill] sm:$0xff] }
 0x1ec   : > { %v1885_v20 = vpop.f32.mrf.mxu0  ;;  %v2086_v15 = vadd.f32 %v3016_v29, %v1899_v1  ;;  %v2088_v31 = vadd.f32 %v2069_v43, %v1901_v10  ;;  %v2087_v39 = vadd.f32 %v4049_v32, %v1900_v12 }
 0x1ed   : > { %v2072_v21 = vpop.f32.mrf.mxu1  ;;  %v1902_v34 = vadd.f32 %v1885_v20, %v1715_v22  ;;  %v2091_v42 = vadd.f32 %v3021_v7, %v1904_v24  ;;  %v4051_v54 = vld [vmem:[#allocation33_spill] sm:$0xff] }
 0x1ee   : > { %v2085_v45 = vadd.f32 %v4051_v54, %v1898_v27 }
 0x1ef   : > { %v2089_v33 = vadd.f32 %v2072_v21, %v1902_v34 }
 0x1fe   : > { %v3040_v17 = vpop.f32.mrf.mxu0 }
 0x1ff   : > { %v2273_v25 = vadd.f32 %v3040_v17, %v2086_v15  ;;  %v3044_v30 = vpop.f32.mrf.mxu1 }
 0x200   : > { %v2277_v38 = vadd.f32 %v3044_v30, %v2090_v16  ;;  %v2240_v29 = vpop.f32.mrf.mxu0 }
 0x201   : > { %v2307_v40 = vadd.f32 %v2715_v23, %v2273_v25  ;;  %v2271_v28 = vadd.f32 %v2240_v29, %v2084_v18  ;;  %v2256_v41 = vpop.f32.mrf.mxu1 }
 0x202   : > { %v2311_v44 = vadd.f32 %v2715_v23, %v2277_v38  ;;  %v2275_v46 = vadd.f32 %v2256_v41, %v2088_v31  ;;  %v3041_v50 = vpop.f32.mrf.mxu0 }
 0x203   : > { %2315 = vst [vmem:[%s592_s6 + $0x10] sm:$0xff] %v2307_v40  ;;  %v2305_v36 = vadd.f32 %v2715_v23, %v2271_v28  ;;  %v2274_v43 = vadd.f32 %v3041_v50, %v2087_v39  ;;  %v3045_v48 = vpop.f32.mrf.mxu1 }
 0x204   : > { %2319 = vst [vmem:[%s592_s6 + $0x30] sm:$0xff] %v2311_v44  ;;  %v2309_v58 = vadd.f32 %v2715_v23, %v2275_v46  ;;  %v2278_v52 = vadd.f32 %v3045_v48, %v2091_v42  ;;  %v2243_v56 = vpop.f32.mrf.mxu0 }
 0x205   : > { %2313 = vst [vmem:[%s592_s6] sm:$0xff] %v2305_v36  ;;  %v2308_v3 = vadd.f32 %v2715_v23, %v2274_v43  ;;  %v2272_v35 = vadd.f32 %v2243_v56, %v2085_v45  ;;  %v2259_v47 = vpop.f32.mrf.mxu1 }
 0x206   : > { %2317 = vst [vmem:[%s592_s6 + $0x20] sm:$0xff] %v2309_v58  ;;  %v2312_v51 = vadd.f32 %v2715_v23, %v2278_v52  ;;  %v2276_v60 = vadd.f32 %v2259_v47, %v2089_v33 }
 0x207   : > { %2316 = vst [vmem:[%s592_s6 + $0x18] sm:$0xff] %v2308_v3  ;;  %v2306_v37 = vadd.f32 %v2715_v23, %v2272_v35 }
 0x208   : > { %2320 = vst [vmem:[%s592_s6 + $0x38] sm:$0xff] %v2312_v51  ;;  %v2310_v55 = vadd.f32 %v2715_v23, %v2276_v60 }
 0x209   : > { %2314 = vst [vmem:[%s592_s6 + $0x8] sm:$0xff] %v2306_v37 }
 0x20a   : > { %2318 = vst [vmem:[%s592_s6 + $0x28] sm:$0xff] %v2310_v55 }
 0x20b   : > { %3492 = shalt.err (!%p3489_p12)
}
 0x20c   : > { %s3493_s15 = scalar_lea.hbm %s3944_s26, 1024  ;;  %s3497_s1 = scalar_lea.hbm %s4053_s23, 2048 }
 0x20d   : > { %p3494_p13 = scmp.ne.s32.totalorder %s3944_s26, %s3493_s15  ;;  %p3498_p9 = scmp.lt.s32.totalorder %s3944_s26, %s4053_s23 }
 0x20e   : > { %p3499_p0 = scmp.lt.s32.totalorder %s3497_s1, %s3493_s15 }
 0x20f   : > { %p3495_p1 = pnand %p3494_p13, %p4054_p4 }
 0x210   : > { %p3500_p7 = por %p3499_p0, %p3498_p9 }
 0x211   : > { %p3496_p5 = pneg %p3495_p1 }
 0x213   : > { %p3501_p8 = pnand %p3500_p7, %p3496_p5 }
 0x215   : > { %3504 = shalt.err (!%p3501_p8)
}
 0x216   : > { %s3587_s11 = smov 128   ;;  %s3588_s17 = smov 8  }
 0x217   : > { %3091 = dma.vmem_to_hbm [thread:$0]  (%p4054_p4), %s3939_s10, 1024, %s3944_s26, %s2322_s14, %s3587_s11, %s3587_s11, %s3588_s17  }
 0x218 PF: > { %s4055_s19 = sld [smem:[#allocation22_spill]] }
 0x219   : > { %s4056_s22 = sld [smem:[#allocation29_spill]] }
 0x21a   : > { %s4057_s8 = sld [smem:[#allocation25_spill]] }
 0x21e   : > { %s2351_s6 = sand.u32 1, %s4055_s19  }
 0x21f   : > { %p4058_p11 = scmp.ne.s32.totalorder %s4056_s22, 0  ;;  %s2352_s9 = scalar_lea.sflag [#allocation5], %s2351_s6 }
 0x220   : > { %p4059_p2 = scmp.ge.s32.totalorder %s4057_s8, 2 }
 0x222   : > { %p3117_p6 = pnand %p4059_p2, %p4058_p11 }
 0x224   : > { %p3118_p3 = pneg %p3117_p6 }
 0x226   : > { %3550 = dma.done.wait (%p3118_p3), %s2352_s9, 1024  }
 0x227   : > { %3552 = vsyncadd (%p3118_p3), %s2352_s9, 4294966272  ;;  %s33_s10 = sadd.s32 1, %s4057_s8   ;;  %s4060_s7 = sld [smem:[#allocation28_spill]] }
 0x228   : > { %p30_p10 = scmp.ge.s32.totalorder %s33_s10, 4   ;;  %s4061_s30 = sld [smem:[#allocation24_spill]] }
 0x229   : > { %s4062_s9 = sld [smem:[#allocation26_spill]]  ;;  %s4063_s27 = smov %s3559_s28 }
 0x22a   : > { %s4064_s28 = smov %s3563_s29  ;;  %32 = sbr.rel (!%p30_p10) target bundleno = 18 (0x12), region = 185 }
 0x22d   : > { %s4065_s29 = smov %s4060_s7 }
 0x22f   :  { %2357 = vsyncpa [#allocation4], 1 }
 0x230   :  { %2359 = vsyncpa [#allocation4 + $0x1], 1 }
 0x231   :  { %2360 = vsyncpa [#allocation7], 1 }
 0x232   :  { %2362 = vsyncpa [#allocation7 + $0x1], 1 }
 0x233   :  { %2363 = vsyncpa [#allocation10], 1 }
 0x234   :  { %2365 = vsyncpa [#allocation10 + $0x1], 1 }
 0x235   :  { %2366 = vsyncpa [#allocation13], 1 }
 0x236   :  { %2368 = vsyncpa [#allocation13 + $0x1], 1 }
 0x237   :  { %2369 = vsyncpa [#allocation5], 1 }
 0x238   :  { %2371 = vsyncpa [#allocation5 + $0x1], 1 }

</bundles_post_ra>
